<compile_context>
chip_gen: v7x
topology: tpu7x:2x2x1
jax: 0.10.0
libtpu: 0.0.40
codegen_flags: <defaults>
</compile_context>

<pallas_src>
import functools

import jax
import jax.numpy as jnp
from jax import lax
from jax.experimental import pallas as pl
from jax.experimental.pallas import tpu as pltpu


def _pick_tile(dim, prefs):
    """Largest preferred tile that divides `dim`, else the full dim."""
    for p in prefs:
        if dim >= p and dim % p == 0:
            return p
    return dim


# ------------------------ tiled linear (bf16 x bf16 -> f32 acc) ------------------------

def _linear_kernel(x_ref, w_ref, b_ref, o_ref, acc_ref, *, activation, nk):
    k = pl.program_id(2)

    @pl.when(k == 0)
    def _():
        acc_ref[...] = jnp.zeros_like(acc_ref)

    acc_ref[...] += jnp.dot(x_ref[...], w_ref[...],
                            preferred_element_type=jnp.float32)

    @pl.when(k == nk - 1)
    def _():
        y = acc_ref[...] + b_ref[...]
        if activation == "gelu_new":
            c = 0.7978845608028654  # sqrt(2/pi)
            y = 0.5 * y * (1.0 + jnp.tanh(c * (y + 0.044715 * y * y * y)))
        o_ref[...] = y.astype(o_ref.dtype)


def linear(x, w, b, activation=None, out_dtype=jnp.float32):
    """x: [M, K], w: [K, N], b: [N] -> [M, N] (bf16 matmul, f32 accumulate)."""
    M, K = x.shape
    N = w.shape[1]
    tm = _pick_tile(M, (256, 128, 64, 32, 16, 8))
    tn = _pick_tile(N, (512, 256, 128))
    tk = _pick_tile(K, (512, 256, 128))
    nk = K // tk
    return pl.pallas_call(
        functools.partial(_linear_kernel, activation=activation, nk=nk),
        out_shape=jax.ShapeDtypeStruct((M, N), out_dtype),
        grid=(M // tm, N // tn, nk),
        in_specs=[
            pl.BlockSpec((tm, tk), lambda i, j, k: (i, k)),
            pl.BlockSpec((tk, tn), lambda i, j, k: (k, j)),
            pl.BlockSpec((1, tn), lambda i, j, k: (0, j)),
        ],
        out_specs=pl.BlockSpec((tm, tn), lambda i, j, k: (i, j)),
        scratch_shapes=[pltpu.VMEM((tm, tn), jnp.float32)],
        compiler_params=pltpu.CompilerParams(
            dimension_semantics=("parallel", "parallel", "arbitrary")),
    )(x.astype(jnp.bfloat16), w.astype(jnp.bfloat16),
      b.astype(jnp.float32).reshape(1, N))


# ------------------------------- row-tiled layernorm -----------------------------------

def _layernorm_kernel(x_ref, g_ref, b_ref, o_ref, *, eps):
    x = x_ref[...]
    mu = jnp.mean(x, axis=-1, keepdims=True)
    var = jnp.mean(jnp.square(x - mu), axis=-1, keepdims=True)
    y = (x - mu) * lax.rsqrt(var + eps) * g_ref[...] + b_ref[...]
    o_ref[...] = y.astype(o_ref.dtype)


def layernorm(x, gamma, beta, eps=1e-5, out_dtype=jnp.bfloat16):
    """Stats in f32; output bf16 (all consumers are bf16 matmuls)."""
    M, D = x.shape
    tm = _pick_tile(M, (1024, 512, 256, 128, 64, 32, 16, 8))
    return pl.pallas_call(
        functools.partial(_layernorm_kernel, eps=eps),
        out_shape=jax.ShapeDtypeStruct((M, D), out_dtype),
        grid=(M // tm,),
        in_specs=[
            pl.BlockSpec((tm, D), lambda i: (i, 0)),
            pl.BlockSpec((1, D), lambda i: (0, 0)),
            pl.BlockSpec((1, D), lambda i: (0, 0)),
        ],
        out_specs=pl.BlockSpec((tm, D), lambda i: (i, 0)),
        compiler_params=pltpu.CompilerParams(dimension_semantics=("parallel",)),
    )(x.astype(jnp.float32), gamma.reshape(1, D), beta.reshape(1, D))


# ----------------------------- flash-style causal attention ----------------------------

def _flash_attn_kernel(q_ref, k_ref, v_ref, o_ref, m_ref, l_ref, acc_ref,
                       *, scale, tq, tk, nk):
    qi = pl.program_id(1)
    ki = pl.program_id(2)

    @pl.when(ki == 0)
    def _():
        m_ref[...] = jnp.full_like(m_ref, -1e30)
        l_ref[...] = jnp.zeros_like(l_ref)
        acc_ref[...] = jnp.zeros_like(acc_ref)

    q_start = qi * tq
    k_start = ki * tk

    def _update(apply_mask):
        q = q_ref[...]                      # [tq, Dh] bf16
        k = k_ref[...]                      # [tk, Dh] bf16
        v = v_ref[...]                      # [tk, Dh] bf16
        # "NT" matmul: contract on the last dim of both operands (no k.T).
        s = lax.dot_general(q, k, (((1,), (1,)), ((), ())),
                            preferred_element_type=jnp.float32) * scale
        if apply_mask:
            row = q_start + lax.broadcasted_iota(jnp.int32, (tq, tk), 0)
            col = k_start + lax.broadcasted_iota(jnp.int32, (tq, tk), 1)
            s = jnp.where(col <= row, s, -1e30)
        m_prev = m_ref[...]
        m_new = jnp.maximum(m_prev, jnp.max(s, axis=-1, keepdims=True))
        alpha = jnp.exp(m_prev - m_new)
        p = jnp.exp(s - m_new)
        l_ref[...] = alpha * l_ref[...] + jnp.sum(p, axis=-1, keepdims=True)
        acc_ref[...] = alpha * acc_ref[...] + jnp.dot(
            p.astype(v.dtype), v, preferred_element_type=jnp.float32)
        m_ref[...] = m_new

    # Three-way split of kv tiles w.r.t. the causal diagonal:
    #   fully below diagonal -> unmasked fast path (no iota / where),
    #   crossing the diagonal -> masked path,
    #   fully above diagonal  -> skipped entirely.
    fully_visible = (k_start + tk - 1) <= q_start
    on_diagonal = jnp.logical_and((k_start + tk - 1) > q_start,
                                  k_start <= (q_start + tq - 1))

    @pl.when(fully_visible)
    def _():
        _update(False)

    @pl.when(on_diagonal)
    def _():
        _update(True)

    @pl.when(ki == nk - 1)
    def _():
        inv_l = pl.reciprocal(l_ref[...], approx=True)
        o_ref[...] = (acc_ref[...] * inv_l).astype(o_ref.dtype)


def causal_flash_attention(q, k, v):
    """q, k, v: [B*H, S, Dh] -> [B*H, S, Dh] bf16, causal softmax(QK^T)V."""
    BH, S, Dh = q.shape
    scale = 1.0 / (Dh ** 0.5)
    tq = _pick_tile(S, (256, 128, 64, 32, 16, 8))
    tk = _pick_tile(S, (128, 256, 64, 32, 16, 8))
    nq, nk = S // tq, S // tk
    q_spec = pl.BlockSpec((None, tq, Dh), lambda bh, qi, ki: (bh, qi, 0))
    kv_spec = pl.BlockSpec((None, tk, Dh), lambda bh, qi, ki: (bh, ki, 0))
    return pl.pallas_call(
        functools.partial(_flash_attn_kernel, scale=scale, tq=tq, tk=tk, nk=nk),
        out_shape=jax.ShapeDtypeStruct((BH, S, Dh), jnp.bfloat16),
        grid=(BH, nq, nk),
        in_specs=[q_spec, kv_spec, kv_spec],
        out_specs=q_spec,
        scratch_shapes=[
            pltpu.VMEM((tq, 1), jnp.float32),
            pltpu.VMEM((tq, 1), jnp.float32),
            pltpu.VMEM((tq, Dh), jnp.float32),
        ],
        compiler_params=pltpu.CompilerParams(
            dimension_semantics=("parallel", "parallel", "arbitrary")),
    )(q.astype(jnp.bfloat16), k.astype(jnp.bfloat16), v.astype(jnp.bfloat16))


# ------------------- fused lm_head (x @ wte^T) + cross-entropy (online LSE) ------------

def _lmhead_ce_kernel(x_ref, w_ref, lab_ref, nll_ref, m_ref, l_ref, p_ref,
                      *, tv, valid_vocab, nj):
    j = pl.program_id(1)

    @pl.when(j == 0)
    def _():
        m_ref[...] = jnp.full_like(m_ref, -1e30)
        l_ref[...] = jnp.zeros_like(l_ref)
        p_ref[...] = jnp.zeros_like(p_ref)

    # logits tile: [tm, tv] = x [tm, E] contracted with wte tile [tv, E] (no wte.T).
    logits = lax.dot_general(x_ref[...], w_ref[...], (((1,), (1,)), ((), ())),
                             preferred_element_type=jnp.float32)
    col = j * tv + lax.broadcasted_iota(jnp.int32, logits.shape, 1)
    # Mask the ragged last vocab tile (cdiv grid; OOB rows of wte are undefined).
    logits = jnp.where(col < valid_vocab, logits, -1e30)

    labels = lab_ref[...]                                   # [tm, 1] int32
    p_ref[...] += jnp.sum(jnp.where(col == labels, logits, 0.0),
                          axis=-1, keepdims=True)

    m_prev = m_ref[...]
    m_new = jnp.maximum(m_prev, jnp.max(logits, axis=-1, keepdims=True))
    l_ref[...] = (jnp.exp(m_prev - m_new) * l_ref[...]
                  + jnp.sum(jnp.exp(logits - m_new), axis=-1, keepdims=True))
    m_ref[...] = m_new

    @pl.when(j == nj - 1)
    def _():
        lse = m_ref[...] + jnp.log(l_ref[...])
        valid = (labels != -100).astype(jnp.float32)  # CrossEntropyLoss ignore_index
        nll_ref[...] = (lse - p_ref[...]) * valid


def fused_lmhead_cross_entropy(x, wte, labels):
    """x: [M, E], wte: [V, E], labels: [M] int -> scalar mean NLL. No HBM logits."""
    M, E = x.shape
    V = wte.shape[0]
    tm = _pick_tile(M, (256, 128, 64, 32, 16, 8))
    tv = min(512, V)                      # ragged last tile handled in-kernel
    nj = pl.cdiv(V, tv)
    nll = pl.pallas_call(
        functools.partial(_lmhead_ce_kernel, tv=tv, valid_vocab=V, nj=nj),
        out_shape=jax.ShapeDtypeStruct((M, 1), jnp.float32),
        grid=(M // tm, nj),
        in_specs=[
            pl.BlockSpec((tm, E), lambda i, j: (i, 0)),
            pl.BlockSpec((tv, E), lambda i, j: (j, 0)),
            pl.BlockSpec((tm, 1), lambda i, j: (i, 0)),
        ],
        out_specs=pl.BlockSpec((tm, 1), lambda i, j: (i, 0)),
        scratch_shapes=[pltpu.VMEM((tm, 1), jnp.float32)] * 3,
        compiler_params=pltpu.CompilerParams(
            dimension_semantics=("parallel", "arbitrary")),
    )(x.astype(jnp.bfloat16), wte.astype(jnp.bfloat16),
      labels.astype(jnp.int32).reshape(M, 1))
    n_valid = jnp.sum((labels != -100).astype(jnp.float32))
    return jnp.sum(nll) / jnp.maximum(n_valid, 1.0)


# ----------------------------------- model (glue) --------------------------------------

def init_params(key, cfg):
    V, P, E, L = cfg["vocab"], cfg["n_pos"], cfg["n_embd"], cfg["n_layer"]
    keys = jax.random.split(key, 2 + L)
    bf16 = jnp.bfloat16
    params = {
        "wte": (0.02 * jax.random.normal(keys[0], (V, E), jnp.float32)).astype(bf16),
        "wpe": 0.02 * jax.random.normal(keys[1], (P, E), jnp.float32),
        "ln_f": (jnp.ones((E,), jnp.float32), jnp.zeros((E,), jnp.float32)),
        "blocks": [],
    }
    for l in range(L):
        k = jax.random.split(keys[2 + l], 4)
        params["blocks"].append({
            "ln1": (jnp.ones((E,), jnp.float32), jnp.zeros((E,), jnp.float32)),
            "c_attn_w": (0.02 * jax.random.normal(k[0], (E, 3 * E), jnp.float32)).astype(bf16),
            "c_attn_b": jnp.zeros((3 * E,), jnp.float32),
            "attn_proj_w": (0.02 * jax.random.normal(k[1], (E, E), jnp.float32)).astype(bf16),
            "attn_proj_b": jnp.zeros((E,), jnp.float32),
            "ln2": (jnp.ones((E,), jnp.float32), jnp.zeros((E,), jnp.float32)),
            "c_fc_w": (0.02 * jax.random.normal(k[2], (E, 4 * E), jnp.float32)).astype(bf16),
            "c_fc_b": jnp.zeros((4 * E,), jnp.float32),
            "mlp_proj_w": (0.02 * jax.random.normal(k[3], (4 * E, E), jnp.float32)).astype(bf16),
            "mlp_proj_b": jnp.zeros((E,), jnp.float32),
        })
    return params


def gpt2_lm_loss(params, input_ids, labels, cfg):
    """Replicates cpu_wrapper.forward: (loss, acc) with unshifted CE over all tokens."""
    B, S = input_ids.shape
    E, H = cfg["n_embd"], cfg["n_head"]
    Dh = E // H
    M = B * S
    assert M % 8 == 0 and S % 8 == 0, "token/seq counts must be multiples of 8"

    # embeddings (glue: gather stays in plain JAX)
    h = jnp.take(params["wte"], input_ids, axis=0).astype(jnp.float32) \
        + params["wpe"][:S][None, :, :]
    # TODO(synk): dropout (embd/attn/resid pdrop) omitted — eval-mode semantics assumed.
    x = h.reshape(M, E)

    for blk in params["blocks"]:
        # --- attention block ---
        g, b = blk["ln1"]
        xn = layernorm(x, g, b)
        qkv = linear(xn, blk["c_attn_w"], blk["c_attn_b"], out_dtype=jnp.bfloat16)
        # TODO(synk): fold this head permute into the attention BlockSpec index_map
        # (requires Dh-major HBM layout); one transpose of qkv kept in plain JAX.
        qkv_h = qkv.reshape(B, S, 3, H, Dh).transpose(2, 0, 3, 1, 4)  # [3,B,H,S,Dh]
        q = qkv_h[0].reshape(B * H, S, Dh)
        k = qkv_h[1].reshape(B * H, S, Dh)
        v = qkv_h[2].reshape(B * H, S, Dh)
        o = causal_flash_attention(q, k, v)                           # [B*H,S,Dh] bf16
        o = o.reshape(B, H, S, Dh).transpose(0, 2, 1, 3).reshape(M, E)
        o = linear(o, blk["attn_proj_w"], blk["attn_proj_b"])
        x = x + o

        # --- MLP block ---
        g, b = blk["ln2"]
        xn = layernorm(x, g, b)
        hdn = linear(xn, blk["c_fc_w"], blk["c_fc_b"],
                     activation="gelu_new", out_dtype=jnp.bfloat16)
        m = linear(hdn, blk["mlp_proj_w"], blk["mlp_proj_b"])
        x = x + m

    g, b = params["ln_f"]
    x = layernorm(x, g, b)

    # lm_head (weight tied to wte, no bias) fused with CrossEntropyLoss.
    loss = fused_lmhead_cross_entropy(x, params["wte"], labels.reshape(M))
    acc = jnp.zeros((0,), jnp.float32)  # mirrors torch.Tensor(0): an empty tensor
    return loss, acc


if __name__ == "__main__":
    cfg = dict(vocab=64, n_pos=16, n_embd=32, n_head=4, n_layer=2)
    key = jax.random.PRNGKey(0)
    pkey, ikey, lkey = jax.random.split(key, 3)
    params = init_params(pkey, cfg)

    B, S = 2, 8
    input_ids = jax.random.randint(ikey, (B, S), 0, cfg["vocab"], dtype=jnp.int32)
    labels = jax.random.randint(lkey, (B, S), 0, cfg["vocab"], dtype=jnp.int32)

    fwd = jax.jit(functools.partial(gpt2_lm_loss, cfg=cfg))
    loss, acc = fwd(params, input_ids, labels)
    jax.block_until_ready(loss)
    assert loss.shape == () and acc.shape == (0,)
    assert bool(jnp.isfinite(loss))
    print("KERNEL_OK")
</pallas_src>

<mosaic_0001>
module attributes {stable_mosaic.version = 11 : i64} {
  func.func @_linear_kernel(%arg0: i32, %arg1: i32, %arg2: i32, %arg3: memref<16x32xbf16, #tpu.memory_space<vmem>>, %arg4: memref<32x96xbf16, #tpu.memory_space<vmem>>, %arg5: memref<1x96xf32, #tpu.memory_space<vmem>>, %arg6: memref<16x96xbf16, #tpu.memory_space<vmem>>, %arg7: memref<16x96xf32, #tpu.memory_space<vmem>>) attributes {dimension_semantics = [#tpu.dimension_semantics<parallel>, #tpu.dimension_semantics<parallel>, #tpu.dimension_semantics<arbitrary>], iteration_bounds = array<i64: 1, 1, 1>, scalar_prefetch = 0 : i64, scratch_operands = 1 : i64, tpu.core_type = #tpu.core_type<tc>, window_params = [{transform_indices = @transform_0, window_bounds = array<i64: 16, 32>}, {transform_indices = @transform_1, window_bounds = array<i64: 32, 96>}, {transform_indices = @transform_2, window_bounds = array<i64: 1, 96>}, {transform_indices = @transform_3, window_bounds = array<i64: 16, 96>}]} {
    %c0_i32 = arith.constant 0 : i32
    %0 = arith.cmpi eq, %arg2, %c0_i32 : i32
    %1 = arith.extui %0 : i1 to i32
    %c0_i32_0 = arith.constant 0 : i32
    %2 = arith.cmpi ne, %1, %c0_i32_0 : i32
    scf.if %2 {
      %cst_10 = arith.constant 0.000000e+00 : f32
      %12 = vector.broadcast %cst_10 : f32 to vector<16x96xf32>
      %c0_11 = arith.constant 0 : index
      %c0_12 = arith.constant 0 : index
      %13 = vector.load %arg7[%c0_11, %c0_12] : memref<16x96xf32, #tpu.memory_space<vmem>>, vector<16x96xf32>
      tpu.vector_store %arg7[%c0_11, %c0_12], %12 {strides = array<i32>} : memref<16x96xf32, #tpu.memory_space<vmem>>, vector<16x96xf32>,
    } else {
    }
    %c0 = arith.constant 0 : index
    %c0_1 = arith.constant 0 : index
    %3 = vector.load %arg7[%c0, %c0_1] : memref<16x96xf32, #tpu.memory_space<vmem>>, vector<16x96xf32>
    %c0_2 = arith.constant 0 : index
    %c0_3 = arith.constant 0 : index
    %4 = vector.load %arg3[%c0_2, %c0_3] : memref<16x32xbf16, #tpu.memory_space<vmem>>, vector<16x32xbf16>
    %c0_4 = arith.constant 0 : index
    %c0_5 = arith.constant 0 : index
    %5 = vector.load %arg4[%c0_4, %c0_5] : memref<32x96xbf16, #tpu.memory_space<vmem>>, vector<32x96xbf16>
    %cst = arith.constant dense<0.000000e+00> : vector<16x96xf32>
    %6 = tpu.matmul %4, %5, %cst {dimension_numbers = #tpu.dot_dimension_numbers<[1], [0], [0], [1], [0, 0, 1, 1], [], []>} : vector<16x32xbf16>, vector<32x96xbf16>, vector<16x96xf32> -> vector<16x96xf32>
    %7 = arith.addf %3, %6 : vector<16x96xf32>
    %c0_6 = arith.constant 0 : index
    %c0_7 = arith.constant 0 : index
    %8 = vector.load %arg7[%c0_6, %c0_7] : memref<16x96xf32, #tpu.memory_space<vmem>>, vector<16x96xf32>
    tpu.vector_store %arg7[%c0_6, %c0_7], %7 {strides = array<i32>} : memref<16x96xf32, #tpu.memory_space<vmem>>, vector<16x96xf32>,
    %c0_i32_8 = arith.constant 0 : i32
    %9 = arith.cmpi eq, %arg2, %c0_i32_8 : i32
    %10 = arith.extui %9 : i1 to i32
    %c0_i32_9 = arith.constant 0 : i32
    %11 = arith.cmpi ne, %10, %c0_i32_9 : i32
    scf.if %11 {
      %c0_10 = arith.constant 0 : index
      %c0_11 = arith.constant 0 : index
      %12 = vector.load %arg7[%c0_10, %c0_11] : memref<16x96xf32, #tpu.memory_space<vmem>>, vector<16x96xf32>
      %c0_12 = arith.constant 0 : index
      %c0_13 = arith.constant 0 : index
      %13 = vector.load %arg5[%c0_12, %c0_13] : memref<1x96xf32, #tpu.memory_space<vmem>>, vector<1x96xf32>
      %14 = vector.broadcast %13 : vector<1x96xf32> to vector<16x96xf32>
      %15 = arith.addf %12, %14 : vector<16x96xf32>
      %16 = arith.truncf %15 : vector<16x96xf32> to vector<16x96xbf16>
      %c0_14 = arith.constant 0 : index
      %c0_15 = arith.constant 0 : index
      %17 = vector.load %arg6[%c0_14, %c0_15] : memref<16x96xbf16, #tpu.memory_space<vmem>>, vector<16x96xbf16>
      tpu.vector_store %arg6[%c0_14, %c0_15], %16 {strides = array<i32>} : memref<16x96xbf16, #tpu.memory_space<vmem>>, vector<16x96xbf16>,
    } else {
    }
    return
  }
  func.func @transform_0(%arg0: i32, %arg1: i32, %arg2: i32) -> (i32, i32) {
    %c0_i32 = arith.constant 0 : i32
    return %arg0, %arg2 : i32, i32
  }
  func.func @transform_1(%arg0: i32, %arg1: i32, %arg2: i32) -> (i32, i32) {
    %c0_i32 = arith.constant 0 : i32
    return %arg2, %arg1 : i32, i32
  }
  func.func @transform_2(%arg0: i32, %arg1: i32, %arg2: i32) -> (i32, i32) {
    %c0_i32 = arith.constant 0 : i32
    %c0_i32_0 = arith.constant 0 : i32
    return %c0_i32, %arg1 : i32, i32
  }
  func.func @transform_3(%arg0: i32, %arg1: i32, %arg2: i32) -> (i32, i32) {
    %c0_i32 = arith.constant 0 : i32
    return %arg0, %arg1 : i32, i32
  }
}

module attributes {stable_mosaic.version = 11 : i64} {
  func.func @_layernorm_kernel(%arg0: i32, %arg1: memref<16x32xf32, #tpu.memory_space<vmem>>, %arg2: memref<1x32xf32, #tpu.memory_space<vmem>>, %arg3: memref<1x32xf32, #tpu.memory_space<vmem>>, %arg4: memref<16x32xbf16, #tpu.memory_space<vmem>>) attributes {dimension_semantics = [#tpu.dimension_semantics<parallel>], iteration_bounds = array<i64: 1>, scalar_prefetch = 0 : i64, scratch_operands = 0 : i64, tpu.core_type = #tpu.core_type<tc>, window_params = [{transform_indices = @transform_0, window_bounds = array<i64: 16, 32>}, {pipeline_mode = #tpu.pipeline_mode<synchronous>, transform_indices = @transform_1, window_bounds = array<i64: 1, 32>}, {pipeline_mode = #tpu.pipeline_mode<synchronous>, transform_indices = @transform_2, window_bounds = array<i64: 1, 32>}, {transform_indices = @transform_3, window_bounds = array<i64: 16, 32>}]} {
    %c0 = arith.constant 0 : index
    %c0_0 = arith.constant 0 : index
    %0 = vector.load %arg1[%c0, %c0_0] : memref<16x32xf32, #tpu.memory_space<vmem>>, vector<16x32xf32>
    %cst = arith.constant dense<0.000000e+00> : vector<16xf32>
    %1 = vector.multi_reduction <add>, %0, %cst [1] : vector<16x32xf32> to vector<16xf32>
    %2 = vector.shape_cast %1 : vector<16xf32> to vector<16x1xf32>
    %cst_1 = arith.constant 3.200000e+01 : f32
    %3 = vector.broadcast %cst_1 : f32 to vector<16x1xf32>
    %4 = arith.divf %2, %3 : vector<16x1xf32>
    %5 = vector.broadcast %4 : vector<16x1xf32> to vector<16x32xf32>
    %6 = arith.subf %0, %5 : vector<16x32xf32>
    %7 = arith.mulf %6, %6 : vector<16x32xf32>
    %cst_2 = arith.constant dense<0.000000e+00> : vector<16xf32>
    %8 = vector.multi_reduction <add>, %7, %cst_2 [1] : vector<16x32xf32> to vector<16xf32>
    %9 = vector.shape_cast %8 : vector<16xf32> to vector<16x1xf32>
    %cst_3 = arith.constant 3.200000e+01 : f32
    %10 = vector.broadcast %cst_3 : f32 to vector<16x1xf32>
    %11 = arith.divf %9, %10 : vector<16x1xf32>
    %12 = vector.broadcast %4 : vector<16x1xf32> to vector<16x32xf32>
    %13 = arith.subf %0, %12 : vector<16x32xf32>
    %cst_4 = arith.constant 9.99999974E-6 : f32
    %14 = vector.broadcast %cst_4 : f32 to vector<16x1xf32>
    %15 = arith.addf %11, %14 : vector<16x1xf32>
    %16 = math.rsqrt %15 : vector<16x1xf32>
    %17 = vector.broadcast %16 : vector<16x1xf32> to vector<16x32xf32>
    %18 = arith.mulf %13, %17 : vector<16x32xf32>
    %c0_5 = arith.constant 0 : index
    %c0_6 = arith.constant 0 : index
    %19 = vector.load %arg2[%c0_5, %c0_6] : memref<1x32xf32, #tpu.memory_space<vmem>>, vector<1x32xf32>
    %20 = vector.broadcast %19 : vector<1x32xf32> to vector<16x32xf32>
    %21 = arith.mulf %18, %20 : vector<16x32xf32>
    %c0_7 = arith.constant 0 : index
    %c0_8 = arith.constant 0 : index
    %22 = vector.load %arg3[%c0_7, %c0_8] : memref<1x32xf32, #tpu.memory_space<vmem>>, vector<1x32xf32>
    %23 = vector.broadcast %22 : vector<1x32xf32> to vector<16x32xf32>
    %24 = arith.addf %21, %23 : vector<16x32xf32>
    %25 = arith.truncf %24 : vector<16x32xf32> to vector<16x32xbf16>
    %c0_9 = arith.constant 0 : index
    %c0_10 = arith.constant 0 : index
    %26 = vector.load %arg4[%c0_9, %c0_10] : memref<16x32xbf16, #tpu.memory_space<vmem>>, vector<16x32xbf16>
    tpu.vector_store %arg4[%c0_9, %c0_10], %25 {strides = array<i32>} : memref<16x32xbf16, #tpu.memory_space<vmem>>, vector<16x32xbf16>,
    return
  }
  func.func @transform_0(%arg0: i32) -> (i32, i32) {
    %c0_i32 = arith.constant 0 : i32
    %c0_i32_0 = arith.constant 0 : i32
    return %arg0, %c0_i32 : i32, i32
  }
  func.func @transform_1(%arg0: i32) -> (i32, i32) {
    %c0_i32 = arith.constant 0 : i32
    %c0_i32_0 = arith.constant 0 : i32
    %c0_i32_1 = arith.constant 0 : i32
    return %c0_i32, %c0_i32_0 : i32, i32
  }
  func.func @transform_2(%arg0: i32) -> (i32, i32) {
    %c0_i32 = arith.constant 0 : i32
    %c0_i32_0 = arith.constant 0 : i32
    %c0_i32_1 = arith.constant 0 : i32
    return %c0_i32, %c0_i32_0 : i32, i32
  }
  func.func @transform_3(%arg0: i32) -> (i32, i32) {
    %c0_i32 = arith.constant 0 : i32
    %c0_i32_0 = arith.constant 0 : i32
    return %arg0, %c0_i32 : i32, i32
  }
}

module attributes {stable_mosaic.version = 11 : i64} {
  func.func @_flash_attn_kernel(%arg0: i32, %arg1: i32, %arg2: i32, %arg3: memref<1x8x8xbf16, #tpu.memory_space<vmem>>, %arg4: memref<1x8x8xbf16, #tpu.memory_space<vmem>>, %arg5: memref<1x8x8xbf16, #tpu.memory_space<vmem>>, %arg6: memref<1x8x8xbf16, #tpu.memory_space<vmem>>, %arg7: memref<8x1xf32, #tpu.memory_space<vmem>>, %arg8: memref<8x1xf32, #tpu.memory_space<vmem>>, %arg9: memref<8x8xf32, #tpu.memory_space<vmem>>) attributes {dimension_semantics = [#tpu.dimension_semantics<parallel>, #tpu.dimension_semantics<parallel>, #tpu.dimension_semantics<arbitrary>], iteration_bounds = array<i64: 8, 1, 1>, scalar_prefetch = 0 : i64, scratch_operands = 3 : i64, tpu.core_type = #tpu.core_type<tc>, window_params = [{transform_indices = @transform_0, window_bounds = array<i64: 1, 8, 8>}, {transform_indices = @transform_1, window_bounds = array<i64: 1, 8, 8>}, {transform_indices = @transform_2, window_bounds = array<i64: 1, 8, 8>}, {transform_indices = @transform_3, window_bounds = array<i64: 1, 8, 8>}]} {
    %c0_i32 = arith.constant 0 : i32
    %0 = arith.cmpi eq, %arg2, %c0_i32 : i32
    %1 = arith.extui %0 : i1 to i32
    %c0_i32_0 = arith.constant 0 : i32
    %2 = arith.cmpi ne, %1, %c0_i32_0 : i32
    scf.if %2 {
      %cst = arith.constant -1.000000e+30 : f32
      %22 = vector.broadcast %cst : f32 to vector<8x1xf32>
      %c0 = arith.constant 0 : index
      %c0_11 = arith.constant 0 : index
      %23 = vector.load %arg7[%c0, %c0_11] : memref<8x1xf32, #tpu.memory_space<vmem>>, vector<8x1xf32>
      tpu.vector_store %arg7[%c0, %c0_11], %22 {strides = array<i32>} : memref<8x1xf32, #tpu.memory_space<vmem>>, vector<8x1xf32>,
      %cst_12 = arith.constant 0.000000e+00 : f32
      %24 = vector.broadcast %cst_12 : f32 to vector<8x1xf32>
      %c0_13 = arith.constant 0 : index
      %c0_14 = arith.constant 0 : index
      %25 = vector.load %arg8[%c0_13, %c0_14] : memref<8x1xf32, #tpu.memory_space<vmem>>, vector<8x1xf32>
      tpu.vector_store %arg8[%c0_13, %c0_14], %24 {strides = array<i32>} : memref<8x1xf32, #tpu.memory_space<vmem>>, vector<8x1xf32>,
      %cst_15 = arith.constant 0.000000e+00 : f32
      %26 = vector.broadcast %cst_15 : f32 to vector<8x8xf32>
      %c0_16 = arith.constant 0 : index
      %c0_17 = arith.constant 0 : index
      %27 = vector.load %arg9[%c0_16, %c0_17] : memref<8x8xf32, #tpu.memory_space<vmem>>, vector<8x8xf32>
      tpu.vector_store %arg9[%c0_16, %c0_17], %26 {strides = array<i32>} : memref<8x8xf32, #tpu.memory_space<vmem>>, vector<8x8xf32>,
    } else {
    }
    %c8_i32 = arith.constant 8 : i32
    %3 = arith.muli %arg1, %c8_i32 : i32
    %c8_i32_1 = arith.constant 8 : i32
    %4 = arith.muli %arg2, %c8_i32_1 : i32
    %c8_i32_2 = arith.constant 8 : i32
    %5 = arith.addi %4, %c8_i32_2 : i32
    %c1_i32 = arith.constant 1 : i32
    %6 = arith.subi %5, %c1_i32 : i32
    %7 = arith.cmpi sle, %6, %3 : i32
    %c8_i32_3 = arith.constant 8 : i32
    %8 = arith.addi %4, %c8_i32_3 : i32
    %c1_i32_4 = arith.constant 1 : i32
    %9 = arith.subi %8, %c1_i32_4 : i32
    %10 = arith.cmpi sgt, %9, %3 : i32
    %c8_i32_5 = arith.constant 8 : i32
    %11 = arith.addi %3, %c8_i32_5 : i32
    %c1_i32_6 = arith.constant 1 : i32
    %12 = arith.subi %11, %c1_i32_6 : i32
    %13 = arith.cmpi sle, %4, %12 : i32
    %14 = arith.andi %10, %13 : i1
    %15 = arith.extui %7 : i1 to i32
    %c0_i32_7 = arith.constant 0 : i32
    %16 = arith.cmpi ne, %15, %c0_i32_7 : i32
    scf.if %16 {
      %c0 = arith.constant 0 : index
      %c0_11 = arith.constant 0 : index
      %c0_12 = arith.constant 0 : index
      %22 = vector.load %arg3[%c0, %c0_11, %c0_12] : memref<1x8x8xbf16, #tpu.memory_space<vmem>>, vector<1x8x8xbf16>
      %23 = vector.shape_cast %22 : vector<1x8x8xbf16> to vector<8x8xbf16>
      %c0_13 = arith.constant 0 : index
      %c0_14 = arith.constant 0 : index
      %c0_15 = arith.constant 0 : index
      %24 = vector.load %arg4[%c0_13, %c0_14, %c0_15] : memref<1x8x8xbf16, #tpu.memory_space<vmem>>, vector<1x8x8xbf16>
      %25 = vector.shape_cast %24 : vector<1x8x8xbf16> to vector<8x8xbf16>
      %c0_16 = arith.constant 0 : index
      %c0_17 = arith.constant 0 : index
      %c0_18 = arith.constant 0 : index
      %26 = vector.load %arg5[%c0_16, %c0_17, %c0_18] : memref<1x8x8xbf16, #tpu.memory_space<vmem>>, vector<1x8x8xbf16>
      %27 = vector.shape_cast %26 : vector<1x8x8xbf16> to vector<8x8xbf16>
      %cst = arith.constant dense<0.000000e+00> : vector<8x8xf32>
      %28 = tpu.matmul %23, %25, %cst {dimension_numbers = #tpu.dot_dimension_numbers<[1], [1], [0], [0], [0, 0, 1, 0], [], []>} : vector<8x8xbf16>, vector<8x8xbf16>, vector<8x8xf32> -> vector<8x8xf32>
      %cst_19 = arith.constant 0.353553385 : f32
      %29 = vector.broadcast %cst_19 : f32 to vector<8x8xf32>
      %30 = arith.mulf %28, %29 : vector<8x8xf32>
      %c0_20 = arith.constant 0 : index
      %c0_21 = arith.constant 0 : index
      %31 = vector.load %arg7[%c0_20, %c0_21] : memref<8x1xf32, #tpu.memory_space<vmem>>, vector<8x1xf32>
      %cst_22 = arith.constant dense<0xFF800000> : vector<8xf32>
      %32 = vector.multi_reduction <maximumf>, %30, %cst_22 [1] : vector<8x8xf32> to vector<8xf32>
      %33 = vector.shape_cast %32 : vector<8xf32> to vector<8x1xf32>
      %34 = arith.maximumf %31, %33 : vector<8x1xf32>
      %35 = arith.subf %31, %34 : vector<8x1xf32>
      %36 = math.exp %35 : vector<8x1xf32>
      %37 = vector.broadcast %34 : vector<8x1xf32> to vector<8x8xf32>
      %38 = arith.subf %30, %37 : vector<8x8xf32>
      %39 = math.exp %38 : vector<8x8xf32>
      %c0_23 = arith.constant 0 : index
      %c0_24 = arith.constant 0 : index
      %40 = vector.load %arg8[%c0_23, %c0_24] : memref<8x1xf32, #tpu.memory_space<vmem>>, vector<8x1xf32>
      %41 = arith.mulf %36, %40 : vector<8x1xf32>
      %cst_25 = arith.constant dense<0.000000e+00> : vector<8xf32>
      %42 = vector.multi_reduction <add>, %39, %cst_25 [1] : vector<8x8xf32> to vector<8xf32>
      %43 = vector.shape_cast %42 : vector<8xf32> to vector<8x1xf32>
      %44 = arith.addf %41, %43 : vector<8x1xf32>
      %c0_26 = arith.constant 0 : index
      %c0_27 = arith.constant 0 : index
      %45 = vector.load %arg8[%c0_26, %c0_27] : memref<8x1xf32, #tpu.memory_space<vmem>>, vector<8x1xf32>
      tpu.vector_store %arg8[%c0_26, %c0_27], %44 {strides = array<i32>} : memref<8x1xf32, #tpu.memory_space<vmem>>, vector<8x1xf32>,
      %c0_28 = arith.constant 0 : index
      %c0_29 = arith.constant 0 : index
      %46 = vector.load %arg9[%c0_28, %c0_29] : memref<8x8xf32, #tpu.memory_space<vmem>>, vector<8x8xf32>
      %47 = vector.broadcast %36 : vector<8x1xf32> to vector<8x8xf32>
      %48 = arith.mulf %47, %46 : vector<8x8xf32>
      %49 = arith.truncf %39 : vector<8x8xf32> to vector<8x8xbf16>
      %cst_30 = arith.constant dense<0.000000e+00> : vector<8x8xf32>
      %50 = tpu.matmul %49, %27, %cst_30 {dimension_numbers = #tpu.dot_dimension_numbers<[1], [0], [0], [1], [0, 0, 1, 1], [], []>} : vector<8x8xbf16>, vector<8x8xbf16>, vector<8x8xf32> -> vector<8x8xf32>
      %51 = arith.addf %48, %50 : vector<8x8xf32>
      %c0_31 = arith.constant 0 : index
      %c0_32 = arith.constant 0 : index
      %52 = vector.load %arg9[%c0_31, %c0_32] : memref<8x8xf32, #tpu.memory_space<vmem>>, vector<8x8xf32>
      tpu.vector_store %arg9[%c0_31, %c0_32], %51 {strides = array<i32>} : memref<8x8xf32, #tpu.memory_space<vmem>>, vector<8x8xf32>,
      %c0_33 = arith.constant 0 : index
      %c0_34 = arith.constant 0 : index
      %53 = vector.load %arg7[%c0_33, %c0_34] : memref<8x1xf32, #tpu.memory_space<vmem>>, vector<8x1xf32>
      tpu.vector_store %arg7[%c0_33, %c0_34], %34 {strides = array<i32>} : memref<8x1xf32, #tpu.memory_space<vmem>>, vector<8x1xf32>,
    } else {
    }
    %17 = arith.extui %14 : i1 to i32
    %c0_i32_8 = arith.constant 0 : i32
    %18 = arith.cmpi ne, %17, %c0_i32_8 : i32
    scf.if %18 {
      %c0 = arith.constant 0 : index
      %c0_11 = arith.constant 0 : index
      %c0_12 = arith.constant 0 : index
      %22 = vector.load %arg3[%c0, %c0_11, %c0_12] : memref<1x8x8xbf16, #tpu.memory_space<vmem>>, vector<1x8x8xbf16>
      %23 = vector.shape_cast %22 : vector<1x8x8xbf16> to vector<8x8xbf16>
      %c0_13 = arith.constant 0 : index
      %c0_14 = arith.constant 0 : index
      %c0_15 = arith.constant 0 : index
      %24 = vector.load %arg4[%c0_13, %c0_14, %c0_15] : memref<1x8x8xbf16, #tpu.memory_space<vmem>>, vector<1x8x8xbf16>
      %25 = vector.shape_cast %24 : vector<1x8x8xbf16> to vector<8x8xbf16>
      %c0_16 = arith.constant 0 : index
      %c0_17 = arith.constant 0 : index
      %c0_18 = arith.constant 0 : index
      %26 = vector.load %arg5[%c0_16, %c0_17, %c0_18] : memref<1x8x8xbf16, #tpu.memory_space<vmem>>, vector<1x8x8xbf16>
      %27 = vector.shape_cast %26 : vector<1x8x8xbf16> to vector<8x8xbf16>
      %cst = arith.constant dense<0.000000e+00> : vector<8x8xf32>
      %28 = tpu.matmul %23, %25, %cst {dimension_numbers = #tpu.dot_dimension_numbers<[1], [1], [0], [0], [0, 0, 1, 0], [], []>} : vector<8x8xbf16>, vector<8x8xbf16>, vector<8x8xf32> -> vector<8x8xf32>
      %cst_19 = arith.constant 0.353553385 : f32
      %29 = vector.broadcast %cst_19 : f32 to vector<8x8xf32>
      %30 = arith.mulf %28, %29 : vector<8x8xf32>
      %31 = tpu.iota {dimensions = array<i32: 0>} : vector<8x8xi32>
      %32 = vector.broadcast %3 : i32 to vector<8x8xi32>
      %33 = arith.addi %32, %31 : vector<8x8xi32>
      %34 = tpu.iota {dimensions = array<i32: 1>} : vector<8x8xi32>
      %35 = vector.broadcast %4 : i32 to vector<8x8xi32>
      %36 = arith.addi %35, %34 : vector<8x8xi32>
      %37 = arith.cmpi sle, %36, %33 : vector<8x8xi32>
      %cst_20 = arith.constant -1.000000e+30 : f32
      %38 = vector.broadcast %cst_20 : f32 to vector<8x8xf32>
      %39 = arith.select %37, %30, %38 : vector<8x8xi1>, vector<8x8xf32>
      %c0_21 = arith.constant 0 : index
      %c0_22 = arith.constant 0 : index
      %40 = vector.load %arg7[%c0_21, %c0_22] : memref<8x1xf32, #tpu.memory_space<vmem>>, vector<8x1xf32>
      %cst_23 = arith.constant dense<0xFF800000> : vector<8xf32>
      %41 = vector.multi_reduction <maximumf>, %39, %cst_23 [1] : vector<8x8xf32> to vector<8xf32>
      %42 = vector.shape_cast %41 : vector<8xf32> to vector<8x1xf32>
      %43 = arith.maximumf %40, %42 : vector<8x1xf32>
      %44 = arith.subf %40, %43 : vector<8x1xf32>
      %45 = math.exp %44 : vector<8x1xf32>
      %46 = vector.broadcast %43 : vector<8x1xf32> to vector<8x8xf32>
      %47 = arith.subf %39, %46 : vector<8x8xf32>
      %48 = math.exp %47 : vector<8x8xf32>
      %c0_24 = arith.constant 0 : index
      %c0_25 = arith.constant 0 : index
      %49 = vector.load %arg8[%c0_24, %c0_25] : memref<8x1xf32, #tpu.memory_space<vmem>>, vector<8x1xf32>
      %50 = arith.mulf %45, %49 : vector<8x1xf32>
      %cst_26 = arith.constant dense<0.000000e+00> : vector<8xf32>
      %51 = vector.multi_reduction <add>, %48, %cst_26 [1] : vector<8x8xf32> to vector<8xf32>
      %52 = vector.shape_cast %51 : vector<8xf32> to vector<8x1xf32>
      %53 = arith.addf %50, %52 : vector<8x1xf32>
      %c0_27 = arith.constant 0 : index
      %c0_28 = arith.constant 0 : index
      %54 = vector.load %arg8[%c0_27, %c0_28] : memref<8x1xf32, #tpu.memory_space<vmem>>, vector<8x1xf32>
      tpu.vector_store %arg8[%c0_27, %c0_28], %53 {strides = array<i32>} : memref<8x1xf32, #tpu.memory_space<vmem>>, vector<8x1xf32>,
      %c0_29 = arith.constant 0 : index
      %c0_30 = arith.constant 0 : index
      %55 = vector.load %arg9[%c0_29, %c0_30] : memref<8x8xf32, #tpu.memory_space<vmem>>, vector<8x8xf32>
      %56 = vector.broadcast %45 : vector<8x1xf32> to vector<8x8xf32>
      %57 = arith.mulf %56, %55 : vector<8x8xf32>
      %58 = arith.truncf %48 : vector<8x8xf32> to vector<8x8xbf16>
      %cst_31 = arith.constant dense<0.000000e+00> : vector<8x8xf32>
      %59 = tpu.matmul %58, %27, %cst_31 {dimension_numbers = #tpu.dot_dimension_numbers<[1], [0], [0], [1], [0, 0, 1, 1], [], []>} : vector<8x8xbf16>, vector<8x8xbf16>, vector<8x8xf32> -> vector<8x8xf32>
      %60 = arith.addf %57, %59 : vector<8x8xf32>
      %c0_32 = arith.constant 0 : index
      %c0_33 = arith.constant 0 : index
      %61 = vector.load %arg9[%c0_32, %c0_33] : memref<8x8xf32, #tpu.memory_space<vmem>>, vector<8x8xf32>
      tpu.vector_store %arg9[%c0_32, %c0_33], %60 {strides = array<i32>} : memref<8x8xf32, #tpu.memory_space<vmem>>, vector<8x8xf32>,
      %c0_34 = arith.constant 0 : index
      %c0_35 = arith.constant 0 : index
      %62 = vector.load %arg7[%c0_34, %c0_35] : memref<8x1xf32, #tpu.memory_space<vmem>>, vector<8x1xf32>
      tpu.vector_store %arg7[%c0_34, %c0_35], %43 {strides = array<i32>} : memref<8x1xf32, #tpu.memory_space<vmem>>, vector<8x1xf32>,
    } else {
    }
    %c0_i32_9 = arith.constant 0 : i32
    %19 = arith.cmpi eq, %arg2, %c0_i32_9 : i32
    %20 = arith.extui %19 : i1 to i32
    %c0_i32_10 = arith.constant 0 : i32
    %21 = arith.cmpi ne, %20, %c0_i32_10 : i32
    scf.if %21 {
      %c0 = arith.constant 0 : index
      %c0_11 = arith.constant 0 : index
      %22 = vector.load %arg8[%c0, %c0_11] : memref<8x1xf32, #tpu.memory_space<vmem>>, vector<8x1xf32>
      %23 = tpu.reciprocal %22 {approx = true} : vector<8x1xf32> -> vector<8x1xf32>
      %c0_12 = arith.constant 0 : index
      %c0_13 = arith.constant 0 : index
      %24 = vector.load %arg9[%c0_12, %c0_13] : memref<8x8xf32, #tpu.memory_space<vmem>>, vector<8x8xf32>
      %25 = vector.broadcast %23 : vector<8x1xf32> to vector<8x8xf32>
      %26 = arith.mulf %24, %25 : vector<8x8xf32>
      %27 = arith.truncf %26 : vector<8x8xf32> to vector<8x8xbf16>
      %c0_14 = arith.constant 0 : index
      %c0_15 = arith.constant 0 : index
      %c0_16 = arith.constant 0 : index
      %28 = vector.load %arg6[%c0_14, %c0_15, %c0_16] : memref<1x8x8xbf16, #tpu.memory_space<vmem>>, vector<1x8x8xbf16>
      %29 = vector.shape_cast %28 : vector<1x8x8xbf16> to vector<8x8xbf16>
      %30 = vector.shape_cast %27 : vector<8x8xbf16> to vector<1x8x8xbf16>
      tpu.vector_store %arg6[%c0_14, %c0_15, %c0_16], %30 {strides = array<i32>} : memref<1x8x8xbf16, #tpu.memory_space<vmem>>, vector<1x8x8xbf16>,
    } else {
    }
    return
  }
  func.func @transform_0(%arg0: i32, %arg1: i32, %arg2: i32) -> (i32, i32, i32) {
    %c0_i32 = arith.constant 0 : i32
    %c0_i32_0 = arith.constant 0 : i32
    return %arg0, %arg1, %c0_i32 : i32, i32, i32
  }
  func.func @transform_1(%arg0: i32, %arg1: i32, %arg2: i32) -> (i32, i32, i32) {
    %c0_i32 = arith.constant 0 : i32
    %c0_i32_0 = arith.constant 0 : i32
    return %arg0, %arg2, %c0_i32 : i32, i32, i32
  }
  func.func @transform_2(%arg0: i32, %arg1: i32, %arg2: i32) -> (i32, i32, i32) {
    %c0_i32 = arith.constant 0 : i32
    %c0_i32_0 = arith.constant 0 : i32
    return %arg0, %arg2, %c0_i32 : i32, i32, i32
  }
  func.func @transform_3(%arg0: i32, %arg1: i32, %arg2: i32) -> (i32, i32, i32) {
    %c0_i32 = arith.constant 0 : i32
    %c0_i32_0 = arith.constant 0 : i32
    return %arg0, %arg1, %c0_i32 : i32, i32, i32
  }
}

module attributes {stable_mosaic.version = 11 : i64} {
  func.func @_linear_kernel(%arg0: i32, %arg1: i32, %arg2: i32, %arg3: memref<16x32xbf16, #tpu.memory_space<vmem>>, %arg4: memref<32x32xbf16, #tpu.memory_space<vmem>>, %arg5: memref<1x32xf32, #tpu.memory_space<vmem>>, %arg6: memref<16x32xf32, #tpu.memory_space<vmem>>, %arg7: memref<16x32xf32, #tpu.memory_space<vmem>>) attributes {dimension_semantics = [#tpu.dimension_semantics<parallel>, #tpu.dimension_semantics<parallel>, #tpu.dimension_semantics<arbitrary>], iteration_bounds = array<i64: 1, 1, 1>, scalar_prefetch = 0 : i64, scratch_operands = 1 : i64, tpu.core_type = #tpu.core_type<tc>, window_params = [{transform_indices = @transform_0, window_bounds = array<i64: 16, 32>}, {transform_indices = @transform_1, window_bounds = array<i64: 32, 32>}, {transform_indices = @transform_2, window_bounds = array<i64: 1, 32>}, {transform_indices = @transform_3, window_bounds = array<i64: 16, 32>}]} {
    %c0_i32 = arith.constant 0 : i32
    %0 = arith.cmpi eq, %arg2, %c0_i32 : i32
    %1 = arith.extui %0 : i1 to i32
    %c0_i32_0 = arith.constant 0 : i32
    %2 = arith.cmpi ne, %1, %c0_i32_0 : i32
    scf.if %2 {
      %cst_10 = arith.constant 0.000000e+00 : f32
      %12 = vector.broadcast %cst_10 : f32 to vector<16x32xf32>
      %c0_11 = arith.constant 0 : index
      %c0_12 = arith.constant 0 : index
      %13 = vector.load %arg7[%c0_11, %c0_12] : memref<16x32xf32, #tpu.memory_space<vmem>>, vector<16x32xf32>
      tpu.vector_store %arg7[%c0_11, %c0_12], %12 {strides = array<i32>} : memref<16x32xf32, #tpu.memory_space<vmem>>, vector<16x32xf32>,
    } else {
    }
    %c0 = arith.constant 0 : index
    %c0_1 = arith.constant 0 : index
    %3 = vector.load %arg7[%c0, %c0_1] : memref<16x32xf32, #tpu.memory_space<vmem>>, vector<16x32xf32>
    %c0_2 = arith.constant 0 : index
    %c0_3 = arith.constant 0 : index
    %4 = vector.load %arg3[%c0_2, %c0_3] : memref<16x32xbf16, #tpu.memory_space<vmem>>, vector<16x32xbf16>
    %c0_4 = arith.constant 0 : index
    %c0_5 = arith.constant 0 : index
    %5 = vector.load %arg4[%c0_4, %c0_5] : memref<32x32xbf16, #tpu.memory_space<vmem>>, vector<32x32xbf16>
    %cst = arith.constant dense<0.000000e+00> : vector<16x32xf32>
    %6 = tpu.matmul %4, %5, %cst {dimension_numbers = #tpu.dot_dimension_numbers<[1], [0], [0], [1], [0, 0, 1, 1], [], []>} : vector<16x32xbf16>, vector<32x32xbf16>, vector<16x32xf32> -> vector<16x32xf32>
    %7 = arith.addf %3, %6 : vector<16x32xf32>
    %c0_6 = arith.constant 0 : index
    %c0_7 = arith.constant 0 : index
    %8 = vector.load %arg7[%c0_6, %c0_7] : memref<16x32xf32, #tpu.memory_space<vmem>>, vector<16x32xf32>
    tpu.vector_store %arg7[%c0_6, %c0_7], %7 {strides = array<i32>} : memref<16x32xf32, #tpu.memory_space<vmem>>, vector<16x32xf32>,
    %c0_i32_8 = arith.constant 0 : i32
    %9 = arith.cmpi eq, %arg2, %c0_i32_8 : i32
    %10 = arith.extui %9 : i1 to i32
    %c0_i32_9 = arith.constant 0 : i32
    %11 = arith.cmpi ne, %10, %c0_i32_9 : i32
    scf.if %11 {
      %c0_10 = arith.constant 0 : index
      %c0_11 = arith.constant 0 : index
      %12 = vector.load %arg7[%c0_10, %c0_11] : memref<16x32xf32, #tpu.memory_space<vmem>>, vector<16x32xf32>
      %c0_12 = arith.constant 0 : index
      %c0_13 = arith.constant 0 : index
      %13 = vector.load %arg5[%c0_12, %c0_13] : memref<1x32xf32, #tpu.memory_space<vmem>>, vector<1x32xf32>
      %14 = vector.broadcast %13 : vector<1x32xf32> to vector<16x32xf32>
      %15 = arith.addf %12, %14 : vector<16x32xf32>
      %c0_14 = arith.constant 0 : index
      %c0_15 = arith.constant 0 : index
      %16 = vector.load %arg6[%c0_14, %c0_15] : memref<16x32xf32, #tpu.memory_space<vmem>>, vector<16x32xf32>
      tpu.vector_store %arg6[%c0_14, %c0_15], %15 {strides = array<i32>} : memref<16x32xf32, #tpu.memory_space<vmem>>, vector<16x32xf32>,
    } else {
    }
    return
  }
  func.func @transform_0(%arg0: i32, %arg1: i32, %arg2: i32) -> (i32, i32) {
    %c0_i32 = arith.constant 0 : i32
    return %arg0, %arg2 : i32, i32
  }
  func.func @transform_1(%arg0: i32, %arg1: i32, %arg2: i32) -> (i32, i32) {
    %c0_i32 = arith.constant 0 : i32
    return %arg2, %arg1 : i32, i32
  }
  func.func @transform_2(%arg0: i32, %arg1: i32, %arg2: i32) -> (i32, i32) {
    %c0_i32 = arith.constant 0 : i32
    %c0_i32_0 = arith.constant 0 : i32
    return %c0_i32, %arg1 : i32, i32
  }
  func.func @transform_3(%arg0: i32, %arg1: i32, %arg2: i32) -> (i32, i32) {
    %c0_i32 = arith.constant 0 : i32
    return %arg0, %arg1 : i32, i32
  }
}

module attributes {stable_mosaic.version = 11 : i64} {
  func.func @_linear_kernel(%arg0: i32, %arg1: i32, %arg2: i32, %arg3: memref<16x32xbf16, #tpu.memory_space<vmem>>, %arg4: memref<32x128xbf16, #tpu.memory_space<vmem>>, %arg5: memref<1x128xf32, #tpu.memory_space<vmem>>, %arg6: memref<16x128xbf16, #tpu.memory_space<vmem>>, %arg7: memref<16x128xf32, #tpu.memory_space<vmem>>) attributes {dimension_semantics = [#tpu.dimension_semantics<parallel>, #tpu.dimension_semantics<parallel>, #tpu.dimension_semantics<arbitrary>], iteration_bounds = array<i64: 1, 1, 1>, scalar_prefetch = 0 : i64, scratch_operands = 1 : i64, tpu.core_type = #tpu.core_type<tc>, window_params = [{transform_indices = @transform_0, window_bounds = array<i64: 16, 32>}, {transform_indices = @transform_1, window_bounds = array<i64: 32, 128>}, {transform_indices = @transform_2, window_bounds = array<i64: 1, 128>}, {transform_indices = @transform_3, window_bounds = array<i64: 16, 128>}]} {
    %c0_i32 = arith.constant 0 : i32
    %0 = arith.cmpi eq, %arg2, %c0_i32 : i32
    %1 = arith.extui %0 : i1 to i32
    %c0_i32_0 = arith.constant 0 : i32
    %2 = arith.cmpi ne, %1, %c0_i32_0 : i32
    scf.if %2 {
      %cst_10 = arith.constant 0.000000e+00 : f32
      %12 = vector.broadcast %cst_10 : f32 to vector<16x128xf32>
      %c0_11 = arith.constant 0 : index
      %c0_12 = arith.constant 0 : index
      %13 = vector.load %arg7[%c0_11, %c0_12] : memref<16x128xf32, #tpu.memory_space<vmem>>, vector<16x128xf32>
      tpu.vector_store %arg7[%c0_11, %c0_12], %12 {strides = array<i32>} : memref<16x128xf32, #tpu.memory_space<vmem>>, vector<16x128xf32>,
    } else {
    }
    %c0 = arith.constant 0 : index
    %c0_1 = arith.constant 0 : index
    %3 = vector.load %arg7[%c0, %c0_1] : memref<16x128xf32, #tpu.memory_space<vmem>>, vector<16x128xf32>
    %c0_2 = arith.constant 0 : index
    %c0_3 = arith.constant 0 : index
    %4 = vector.load %arg3[%c0_2, %c0_3] : memref<16x32xbf16, #tpu.memory_space<vmem>>, vector<16x32xbf16>
    %c0_4 = arith.constant 0 : index
    %c0_5 = arith.constant 0 : index
    %5 = vector.load %arg4[%c0_4, %c0_5] : memref<32x128xbf16, #tpu.memory_space<vmem>>, vector<32x128xbf16>
    %cst = arith.constant dense<0.000000e+00> : vector<16x128xf32>
    %6 = tpu.matmul %4, %5, %cst {dimension_numbers = #tpu.dot_dimension_numbers<[1], [0], [0], [1], [0, 0, 1, 1], [], []>} : vector<16x32xbf16>, vector<32x128xbf16>, vector<16x128xf32> -> vector<16x128xf32>
    %7 = arith.addf %3, %6 : vector<16x128xf32>
    %c0_6 = arith.constant 0 : index
    %c0_7 = arith.constant 0 : index
    %8 = vector.load %arg7[%c0_6, %c0_7] : memref<16x128xf32, #tpu.memory_space<vmem>>, vector<16x128xf32>
    tpu.vector_store %arg7[%c0_6, %c0_7], %7 {strides = array<i32>} : memref<16x128xf32, #tpu.memory_space<vmem>>, vector<16x128xf32>,
    %c0_i32_8 = arith.constant 0 : i32
    %9 = arith.cmpi eq, %arg2, %c0_i32_8 : i32
    %10 = arith.extui %9 : i1 to i32
    %c0_i32_9 = arith.constant 0 : i32
    %11 = arith.cmpi ne, %10, %c0_i32_9 : i32
    scf.if %11 {
      %c0_10 = arith.constant 0 : index
      %c0_11 = arith.constant 0 : index
      %12 = vector.load %arg7[%c0_10, %c0_11] : memref<16x128xf32, #tpu.memory_space<vmem>>, vector<16x128xf32>
      %c0_12 = arith.constant 0 : index
      %c0_13 = arith.constant 0 : index
      %13 = vector.load %arg5[%c0_12, %c0_13] : memref<1x128xf32, #tpu.memory_space<vmem>>, vector<1x128xf32>
      %14 = vector.broadcast %13 : vector<1x128xf32> to vector<16x128xf32>
      %15 = arith.addf %12, %14 : vector<16x128xf32>
      %cst_14 = arith.constant 5.000000e-01 : f32
      %16 = vector.broadcast %cst_14 : f32 to vector<16x128xf32>
      %17 = arith.mulf %16, %15 : vector<16x128xf32>
      %cst_15 = arith.constant 4.471500e-02 : f32
      %18 = vector.broadcast %cst_15 : f32 to vector<16x128xf32>
      %19 = arith.mulf %18, %15 : vector<16x128xf32>
      %20 = arith.mulf %19, %15 : vector<16x128xf32>
      %21 = arith.mulf %20, %15 : vector<16x128xf32>
      %22 = arith.addf %15, %21 : vector<16x128xf32>
      %cst_16 = arith.constant 0.797884583 : f32
      %23 = vector.broadcast %cst_16 : f32 to vector<16x128xf32>
      %24 = arith.mulf %23, %22 : vector<16x128xf32>
      %25 = math.tanh %24 : vector<16x128xf32>
      %cst_17 = arith.constant 1.000000e+00 : f32
      %26 = vector.broadcast %cst_17 : f32 to vector<16x128xf32>
      %27 = arith.addf %26, %25 : vector<16x128xf32>
      %28 = arith.mulf %17, %27 : vector<16x128xf32>
      %29 = arith.truncf %28 : vector<16x128xf32> to vector<16x128xbf16>
      %c0_18 = arith.constant 0 : index
      %c0_19 = arith.constant 0 : index
      %30 = vector.load %arg6[%c0_18, %c0_19] : memref<16x128xbf16, #tpu.memory_space<vmem>>, vector<16x128xbf16>
      tpu.vector_store %arg6[%c0_18, %c0_19], %29 {strides = array<i32>} : memref<16x128xbf16, #tpu.memory_space<vmem>>, vector<16x128xbf16>,
    } else {
    }
    return
  }
  func.func @transform_0(%arg0: i32, %arg1: i32, %arg2: i32) -> (i32, i32) {
    %c0_i32 = arith.constant 0 : i32
    return %arg0, %arg2 : i32, i32
  }
  func.func @transform_1(%arg0: i32, %arg1: i32, %arg2: i32) -> (i32, i32) {
    %c0_i32 = arith.constant 0 : i32
    return %arg2, %arg1 : i32, i32
  }
  func.func @transform_2(%arg0: i32, %arg1: i32, %arg2: i32) -> (i32, i32) {
    %c0_i32 = arith.constant 0 : i32
    %c0_i32_0 = arith.constant 0 : i32
    return %c0_i32, %arg1 : i32, i32
  }
  func.func @transform_3(%arg0: i32, %arg1: i32, %arg2: i32) -> (i32, i32) {
    %c0_i32 = arith.constant 0 : i32
    return %arg0, %arg1 : i32, i32
  }
}

module attributes {stable_mosaic.version = 11 : i64} {
  func.func @_lmhead_ce_kernel(%arg0: i32, %arg1: i32, %arg2: memref<16x32xbf16, #tpu.memory_space<vmem>>, %arg3: memref<64x32xbf16, #tpu.memory_space<vmem>>, %arg4: memref<16x1xi32, #tpu.memory_space<vmem>>, %arg5: memref<16x1xf32, #tpu.memory_space<vmem>>, %arg6: memref<16x1xf32, #tpu.memory_space<vmem>>, %arg7: memref<16x1xf32, #tpu.memory_space<vmem>>, %arg8: memref<16x1xf32, #tpu.memory_space<vmem>>) attributes {dimension_semantics = [#tpu.dimension_semantics<parallel>, #tpu.dimension_semantics<arbitrary>], iteration_bounds = array<i64: 1, 1>, scalar_prefetch = 0 : i64, scratch_operands = 3 : i64, tpu.core_type = #tpu.core_type<tc>, window_params = [{transform_indices = @transform_0, window_bounds = array<i64: 16, 32>}, {transform_indices = @transform_1, window_bounds = array<i64: 64, 32>}, {transform_indices = @transform_2, window_bounds = array<i64: 16, 1>}, {transform_indices = @transform_3, window_bounds = array<i64: 16, 1>}]} {
    %c0_i32 = arith.constant 0 : i32
    %0 = arith.cmpi eq, %arg1, %c0_i32 : i32
    %1 = arith.extui %0 : i1 to i32
    %c0_i32_0 = arith.constant 0 : i32
    %2 = arith.cmpi ne, %1, %c0_i32_0 : i32
    scf.if %2 {
      %cst_26 = arith.constant -1.000000e+30 : f32
      %43 = vector.broadcast %cst_26 : f32 to vector<16x1xf32>
      %c0_27 = arith.constant 0 : index
      %c0_28 = arith.constant 0 : index
      %44 = vector.load %arg6[%c0_27, %c0_28] : memref<16x1xf32, #tpu.memory_space<vmem>>, vector<16x1xf32>
      tpu.vector_store %arg6[%c0_27, %c0_28], %43 {strides = array<i32>} : memref<16x1xf32, #tpu.memory_space<vmem>>, vector<16x1xf32>,
      %cst_29 = arith.constant 0.000000e+00 : f32
      %45 = vector.broadcast %cst_29 : f32 to vector<16x1xf32>
      %c0_30 = arith.constant 0 : index
      %c0_31 = arith.constant 0 : index
      %46 = vector.load %arg7[%c0_30, %c0_31] : memref<16x1xf32, #tpu.memory_space<vmem>>, vector<16x1xf32>
      tpu.vector_store %arg7[%c0_30, %c0_31], %45 {strides = array<i32>} : memref<16x1xf32, #tpu.memory_space<vmem>>, vector<16x1xf32>,
      %cst_32 = arith.constant 0.000000e+00 : f32
      %47 = vector.broadcast %cst_32 : f32 to vector<16x1xf32>
      %c0_33 = arith.constant 0 : index
      %c0_34 = arith.constant 0 : index
      %48 = vector.load %arg8[%c0_33, %c0_34] : memref<16x1xf32, #tpu.memory_space<vmem>>, vector<16x1xf32>
      tpu.vector_store %arg8[%c0_33, %c0_34], %47 {strides = array<i32>} : memref<16x1xf32, #tpu.memory_space<vmem>>, vector<16x1xf32>,
    } else {
    }
    %c0 = arith.constant 0 : index
    %c0_1 = arith.constant 0 : index
    %3 = vector.load %arg2[%c0, %c0_1] : memref<16x32xbf16, #tpu.memory_space<vmem>>, vector<16x32xbf16>
    %c0_2 = arith.constant 0 : index
    %c0_3 = arith.constant 0 : index
    %4 = vector.load %arg3[%c0_2, %c0_3] : memref<64x32xbf16, #tpu.memory_space<vmem>>, vector<64x32xbf16>
    %cst = arith.constant dense<0.000000e+00> : vector<16x64xf32>
    %5 = tpu.matmul %3, %4, %cst {dimension_numbers = #tpu.dot_dimension_numbers<[1], [1], [0], [0], [0, 0, 1, 0], [], []>} : vector<16x32xbf16>, vector<64x32xbf16>, vector<16x64xf32> -> vector<16x64xf32>
    %c64_i32 = arith.constant 64 : i32
    %6 = arith.muli %arg1, %c64_i32 : i32
    %7 = tpu.iota {dimensions = array<i32: 1>} : vector<16x64xi32>
    %8 = vector.broadcast %6 : i32 to vector<16x64xi32>
    %9 = arith.addi %8, %7 : vector<16x64xi32>
    %c64_i32_4 = arith.constant 64 : i32
    %10 = vector.broadcast %c64_i32_4 : i32 to vector<16x64xi32>
    %11 = arith.cmpi slt, %9, %10 : vector<16x64xi32>
    %cst_5 = arith.constant -1.000000e+30 : f32
    %12 = vector.broadcast %cst_5 : f32 to vector<16x64xf32>
    %13 = arith.select %11, %5, %12 : vector<16x64xi1>, vector<16x64xf32>
    %c0_6 = arith.constant 0 : index
    %c0_7 = arith.constant 0 : index
    %14 = vector.load %arg4[%c0_6, %c0_7] : memref<16x1xi32, #tpu.memory_space<vmem>>, vector<16x1xi32>
    %c0_8 = arith.constant 0 : index
    %c0_9 = arith.constant 0 : index
    %15 = vector.load %arg8[%c0_8, %c0_9] : memref<16x1xf32, #tpu.memory_space<vmem>>, vector<16x1xf32>
    %16 = vector.broadcast %14 : vector<16x1xi32> to vector<16x64xi32>
    %17 = arith.cmpi eq, %9, %16 : vector<16x64xi32>
    %cst_10 = arith.constant 0.000000e+00 : f32
    %18 = vector.broadcast %cst_10 : f32 to vector<16x64xf32>
    %19 = arith.select %17, %13, %18 : vector<16x64xi1>, vector<16x64xf32>
    %cst_11 = arith.constant dense<0.000000e+00> : vector<16xf32>
    %20 = vector.multi_reduction <add>, %19, %cst_11 [1] : vector<16x64xf32> to vector<16xf32>
    %21 = vector.shape_cast %20 : vector<16xf32> to vector<16x1xf32>
    %22 = arith.addf %15, %21 : vector<16x1xf32>
    %c0_12 = arith.constant 0 : index
    %c0_13 = arith.constant 0 : index
    %23 = vector.load %arg8[%c0_12, %c0_13] : memref<16x1xf32, #tpu.memory_space<vmem>>, vector<16x1xf32>
    tpu.vector_store %arg8[%c0_12, %c0_13], %22 {strides = array<i32>} : memref<16x1xf32, #tpu.memory_space<vmem>>, vector<16x1xf32>,
    %c0_14 = arith.constant 0 : index
    %c0_15 = arith.constant 0 : index
    %24 = vector.load %arg6[%c0_14, %c0_15] : memref<16x1xf32, #tpu.memory_space<vmem>>, vector<16x1xf32>
    %cst_16 = arith.constant dense<0xFF800000> : vector<16xf32>
    %25 = vector.multi_reduction <maximumf>, %13, %cst_16 [1] : vector<16x64xf32> to vector<16xf32>
    %26 = vector.shape_cast %25 : vector<16xf32> to vector<16x1xf32>
    %27 = arith.maximumf %24, %26 : vector<16x1xf32>
    %28 = arith.subf %24, %27 : vector<16x1xf32>
    %29 = math.exp %28 : vector<16x1xf32>
    %c0_17 = arith.constant 0 : index
    %c0_18 = arith.constant 0 : index
    %30 = vector.load %arg7[%c0_17, %c0_18] : memref<16x1xf32, #tpu.memory_space<vmem>>, vector<16x1xf32>
    %31 = arith.mulf %29, %30 : vector<16x1xf32>
    %32 = vector.broadcast %27 : vector<16x1xf32> to vector<16x64xf32>
    %33 = arith.subf %13, %32 : vector<16x64xf32>
    %34 = math.exp %33 : vector<16x64xf32>
    %cst_19 = arith.constant dense<0.000000e+00> : vector<16xf32>
    %35 = vector.multi_reduction <add>, %34, %cst_19 [1] : vector<16x64xf32> to vector<16xf32>
    %36 = vector.shape_cast %35 : vector<16xf32> to vector<16x1xf32>
    %37 = arith.addf %31, %36 : vector<16x1xf32>
    %c0_20 = arith.constant 0 : index
    %c0_21 = arith.constant 0 : index
    %38 = vector.load %arg7[%c0_20, %c0_21] : memref<16x1xf32, #tpu.memory_space<vmem>>, vector<16x1xf32>
    tpu.vector_store %arg7[%c0_20, %c0_21], %37 {strides = array<i32>} : memref<16x1xf32, #tpu.memory_space<vmem>>, vector<16x1xf32>,
    %c0_22 = arith.constant 0 : index
    %c0_23 = arith.constant 0 : index
    %39 = vector.load %arg6[%c0_22, %c0_23] : memref<16x1xf32, #tpu.memory_space<vmem>>, vector<16x1xf32>
    tpu.vector_store %arg6[%c0_22, %c0_23], %27 {strides = array<i32>} : memref<16x1xf32, #tpu.memory_space<vmem>>, vector<16x1xf32>,
    %c0_i32_24 = arith.constant 0 : i32
    %40 = arith.cmpi eq, %arg1, %c0_i32_24 : i32
    %41 = arith.extui %40 : i1 to i32
    %c0_i32_25 = arith.constant 0 : i32
    %42 = arith.cmpi ne, %41, %c0_i32_25 : i32
    scf.if %42 {
      %c0_26 = arith.constant 0 : index
      %c0_27 = arith.constant 0 : index
      %43 = vector.load %arg6[%c0_26, %c0_27] : memref<16x1xf32, #tpu.memory_space<vmem>>, vector<16x1xf32>
      %c0_28 = arith.constant 0 : index
      %c0_29 = arith.constant 0 : index
      %44 = vector.load %arg7[%c0_28, %c0_29] : memref<16x1xf32, #tpu.memory_space<vmem>>, vector<16x1xf32>
      %45 = math.log %44 : vector<16x1xf32>
      %46 = arith.addf %43, %45 : vector<16x1xf32>
      %c-100_i32 = arith.constant -100 : i32
      %47 = vector.broadcast %c-100_i32 : i32 to vector<16x1xi32>
      %48 = arith.cmpi ne, %14, %47 : vector<16x1xi32>
      %49 = arith.extui %48 : vector<16x1xi1> to vector<16x1xi32>
      %50 = arith.sitofp %49 : vector<16x1xi32> to vector<16x1xf32>
      %c0_30 = arith.constant 0 : index
      %c0_31 = arith.constant 0 : index
      %51 = vector.load %arg8[%c0_30, %c0_31] : memref<16x1xf32, #tpu.memory_space<vmem>>, vector<16x1xf32>
      %52 = arith.subf %46, %51 : vector<16x1xf32>
      %53 = arith.mulf %52, %50 : vector<16x1xf32>
      %c0_32 = arith.constant 0 : index
      %c0_33 = arith.constant 0 : index
      %54 = vector.load %arg5[%c0_32, %c0_33] : memref<16x1xf32, #tpu.memory_space<vmem>>, vector<16x1xf32>
      tpu.vector_store %arg5[%c0_32, %c0_33], %53 {strides = array<i32>} : memref<16x1xf32, #tpu.memory_space<vmem>>, vector<16x1xf32>,
    } else {
    }
    return
  }
  func.func @transform_0(%arg0: i32, %arg1: i32) -> (i32, i32) {
    %c0_i32 = arith.constant 0 : i32
    %c0_i32_0 = arith.constant 0 : i32
    return %arg0, %c0_i32 : i32, i32
  }
  func.func @transform_1(%arg0: i32, %arg1: i32) -> (i32, i32) {
    %c0_i32 = arith.constant 0 : i32
    %c0_i32_0 = arith.constant 0 : i32
    return %arg1, %c0_i32 : i32, i32
  }
  func.func @transform_2(%arg0: i32, %arg1: i32) -> (i32, i32) {
    %c0_i32 = arith.constant 0 : i32
    %c0_i32_0 = arith.constant 0 : i32
    return %arg0, %c0_i32 : i32, i32
  }
  func.func @transform_3(%arg0: i32, %arg1: i32) -> (i32, i32) {
    %c0_i32 = arith.constant 0 : i32
    %c0_i32_0 = arith.constant 0 : i32
    return %arg0, %c0_i32 : i32, i32
  }
}

module attributes {stable_mosaic.version = 11 : i64} {
  func.func @_linear_kernel(%arg0: i32, %arg1: i32, %arg2: i32, %arg3: memref<16x128xbf16, #tpu.memory_space<vmem>>, %arg4: memref<128x32xbf16, #tpu.memory_space<vmem>>, %arg5: memref<1x32xf32, #tpu.memory_space<vmem>>, %arg6: memref<16x32xf32, #tpu.memory_space<vmem>>, %arg7: memref<16x32xf32, #tpu.memory_space<vmem>>) attributes {dimension_semantics = [#tpu.dimension_semantics<parallel>, #tpu.dimension_semantics<parallel>, #tpu.dimension_semantics<arbitrary>], iteration_bounds = array<i64: 1, 1, 1>, scalar_prefetch = 0 : i64, scratch_operands = 1 : i64, tpu.core_type = #tpu.core_type<tc>, window_params = [{transform_indices = @transform_0, window_bounds = array<i64: 16, 128>}, {transform_indices = @transform_1, window_bounds = array<i64: 128, 32>}, {transform_indices = @transform_2, window_bounds = array<i64: 1, 32>}, {transform_indices = @transform_3, window_bounds = array<i64: 16, 32>}]} {
    %c0_i32 = arith.constant 0 : i32
    %0 = arith.cmpi eq, %arg2, %c0_i32 : i32
    %1 = arith.extui %0 : i1 to i32
    %c0_i32_0 = arith.constant 0 : i32
    %2 = arith.cmpi ne, %1, %c0_i32_0 : i32
    scf.if %2 {
      %cst_10 = arith.constant 0.000000e+00 : f32
      %12 = vector.broadcast %cst_10 : f32 to vector<16x32xf32>
      %c0_11 = arith.constant 0 : index
      %c0_12 = arith.constant 0 : index
      %13 = vector.load %arg7[%c0_11, %c0_12] : memref<16x32xf32, #tpu.memory_space<vmem>>, vector<16x32xf32>
      tpu.vector_store %arg7[%c0_11, %c0_12], %12 {strides = array<i32>} : memref<16x32xf32, #tpu.memory_space<vmem>>, vector<16x32xf32>,
    } else {
    }
    %c0 = arith.constant 0 : index
    %c0_1 = arith.constant 0 : index
    %3 = vector.load %arg7[%c0, %c0_1] : memref<16x32xf32, #tpu.memory_space<vmem>>, vector<16x32xf32>
    %c0_2 = arith.constant 0 : index
    %c0_3 = arith.constant 0 : index
    %4 = vector.load %arg3[%c0_2, %c0_3] : memref<16x128xbf16, #tpu.memory_space<vmem>>, vector<16x128xbf16>
    %c0_4 = arith.constant 0 : index
    %c0_5 = arith.constant 0 : index
    %5 = vector.load %arg4[%c0_4, %c0_5] : memref<128x32xbf16, #tpu.memory_space<vmem>>, vector<128x32xbf16>
    %cst = arith.constant dense<0.000000e+00> : vector<16x32xf32>
    %6 = tpu.matmul %4, %5, %cst {dimension_numbers = #tpu.dot_dimension_numbers<[1], [0], [0], [1], [0, 0, 1, 1], [], []>} : vector<16x128xbf16>, vector<128x32xbf16>, vector<16x32xf32> -> vector<16x32xf32>
    %7 = arith.addf %3, %6 : vector<16x32xf32>
    %c0_6 = arith.constant 0 : index
    %c0_7 = arith.constant 0 : index
    %8 = vector.load %arg7[%c0_6, %c0_7] : memref<16x32xf32, #tpu.memory_space<vmem>>, vector<16x32xf32>
    tpu.vector_store %arg7[%c0_6, %c0_7], %7 {strides = array<i32>} : memref<16x32xf32, #tpu.memory_space<vmem>>, vector<16x32xf32>,
    %c0_i32_8 = arith.constant 0 : i32
    %9 = arith.cmpi eq, %arg2, %c0_i32_8 : i32
    %10 = arith.extui %9 : i1 to i32
    %c0_i32_9 = arith.constant 0 : i32
    %11 = arith.cmpi ne, %10, %c0_i32_9 : i32
    scf.if %11 {
      %c0_10 = arith.constant 0 : index
      %c0_11 = arith.constant 0 : index
      %12 = vector.load %arg7[%c0_10, %c0_11] : memref<16x32xf32, #tpu.memory_space<vmem>>, vector<16x32xf32>
      %c0_12 = arith.constant 0 : index
      %c0_13 = arith.constant 0 : index
      %13 = vector.load %arg5[%c0_12, %c0_13] : memref<1x32xf32, #tpu.memory_space<vmem>>, vector<1x32xf32>
      %14 = vector.broadcast %13 : vector<1x32xf32> to vector<16x32xf32>
      %15 = arith.addf %12, %14 : vector<16x32xf32>
      %c0_14 = arith.constant 0 : index
      %c0_15 = arith.constant 0 : index
      %16 = vector.load %arg6[%c0_14, %c0_15] : memref<16x32xf32, #tpu.memory_space<vmem>>, vector<16x32xf32>
      tpu.vector_store %arg6[%c0_14, %c0_15], %15 {strides = array<i32>} : memref<16x32xf32, #tpu.memory_space<vmem>>, vector<16x32xf32>,
    } else {
    }
    return
  }
  func.func @transform_0(%arg0: i32, %arg1: i32, %arg2: i32) -> (i32, i32) {
    %c0_i32 = arith.constant 0 : i32
    return %arg0, %arg2 : i32, i32
  }
  func.func @transform_1(%arg0: i32, %arg1: i32, %arg2: i32) -> (i32, i32) {
    %c0_i32 = arith.constant 0 : i32
    return %arg2, %arg1 : i32, i32
  }
  func.func @transform_2(%arg0: i32, %arg1: i32, %arg2: i32) -> (i32, i32) {
    %c0_i32 = arith.constant 0 : i32
    %c0_i32_0 = arith.constant 0 : i32
    return %c0_i32, %arg1 : i32, i32
  }
  func.func @transform_3(%arg0: i32, %arg1: i32, %arg2: i32) -> (i32, i32) {
    %c0_i32 = arith.constant 0 : i32
    return %arg0, %arg1 : i32, i32
  }
}

</mosaic_0001>

<bundles_post_ra>
// kernel: gpt2_lm_loss.17
= control target key start
LH: loop header
LB: loop body
LE: loop exit
PB: predicated region body
PF: predicated region fallthrough
CT: control target
= control target key end

     0   :  { %vm19_vm0 = vcmask 785408   ;;  %v151_v0 = vmov 0.0   ;;  %vm152_vm1 = vmmov 0   ;;  %vm47_vm2 = vcmask 261120   ;;  %s195_s1 = inlined_call_operand.vmem [shape: bf16[32,96], index: 1, kind: input, shape index: {}]   ;;  %s196_s0 = inlined_call_operand.vmem [shape: bf16[16,32], index: 0, kind: input, shape index: {}]   ;;  %s197_s2 = inlined_call_operand.vmem [shape: f32[1,96], index: 2, kind: input, shape index: {}]   ;;  %s198_s3 = inlined_call_operand.vmem [shape: bf16[16,96], index: 3, kind: output, shape index: {}]  }
   0x1   :  { %138 = vmatprep.subr.bf16.mxu0 %v151_v0  ;;  %v148_v1 = vld [vmem:[%s195_s1] sm:$0xff]   ;;  %142 = vmatprep.mubr.msk.bf16.mxu0 %vm152_vm1, %v151_v0  ;;  %20 = vst.msk [vmem:[#allocation2] sm:$0xff] %vm19_vm0, %v151_v0  ;;  %21 = vst.msk [vmem:[#allocation2 + $0x8] sm:$0xff] %vm19_vm0, %v151_v0  ;;  %v149_v2 = vld [vmem:[%s195_s1 + $0x8] sm:$0xff]   ;;  %vm119_vm3 = vcmask 781312  }
   0x2   :  { %139 = vmatpush3.bf16.msra.mxu0 %v148_v1  ;;  %v150_v3 = vld [vmem:[%s196_s0] sm:$0xff]  }
   0x3   :  { %140 = vmatprep.subr.bf16.mxu0 %v151_v0  ;;  %v130_v12 = vld [vmem:[%s197_s2] ss:$0 sm:$0xff] }
   0x6   :  { %141 = vmatpush3.bf16.msra.mxu0 %v149_v2 }
   0x8   :  { %v22_v4 = vld [vmem:[#allocation2] sm:$0xff]  ;;  %v23_v6 = vld [vmem:[#allocation2 + $0x8] sm:$0xff] }
   0x9   :  { %143 = vmatmul.mubr.msk.bf16.vlgmr.msra.gmra.mrb[0].mxu0 %vm47_vm2, %v150_v3 }
  0xdc   :  { %v85_v5 = vpop.f32.mrb[0].mxu0 }
  0xdd   :  { %v92_v7 = vadd.f32 %v85_v5, %v22_v4  ;;  %v144_v8 = vpop.f32.mrb[1].mxu0 }
  0xde   :  { %v88_v9 = vpop.f32.mrb[2].mxu0 }
  0xdf   :  { %95 = vst.msk [vmem:[#allocation2] sm:$0xff] %vm19_vm0, %v92_v7  ;;  %v93_v10 = vadd.f32 %v88_v9, %v23_v6  ;;  %v145_v11 = vpop.f32.mrb[3].mxu0 }
  0xe1   :  { %96 = vst.msk [vmem:[#allocation2 + $0x8] sm:$0xff] %vm19_vm0, %v93_v10 }
  0xe6   :  { %v100_v13 = vld [vmem:[#allocation2] sm:$0xff] }
  0xe7   :  { %v109_v14 = vadd.f32 %v130_v12, %v100_v13 }
  0xe8   :  { %v101_v15 = vld [vmem:[#allocation2 + $0x8] sm:$0xff] }
  0xe9   :  { %v133_v16 = vpack.c.bf16 %v109_v14, %v109_v14  ;;  %v110_v17 = vadd.f32 %v130_v12, %v101_v15 }
  0xeb   :  { %120 = vst.msk [vmem:[%s198_s3] sm:$0xf] %vm119_vm3, %v133_v16  ;;  %v134_v18 = vpack.c.bf16 %v110_v17, %v110_v17 }
  0xed   :  { %121 = vst.msk [vmem:[%s198_s3 + $0x4] sm:$0xf] %vm119_vm3, %v134_v18 }

// kernel: gpt2_lm_loss.16
= control target key start
LH: loop header
LB: loop body
LE: loop exit
PB: predicated region body
PF: predicated region fallthrough
CT: control target
= control target key end

     0   :  { %vm16_vm0 = vcmask 261120   ;;  %vm70_vm1 = vcmask 257024   ;;  %s129_s0 = inlined_call_operand.vmem [shape: f32[16,32], index: 0, kind: input, shape index: {}]   ;;  %s130_s1 = inlined_call_operand.vmem [shape: f32[1,32], index: 1, kind: input, shape index: {}]   ;;  %s131_s2 = inlined_call_operand.vmem [shape: f32[1,32], index: 2, kind: input, shape index: {}]   ;;  %s132_s3 = inlined_call_operand.vmem [shape: bf16[16,32], index: 3, kind: output, shape index: {}]  }
   0x1   :  { %v14_v0 = vld [vmem:[%s129_s0] sm:$0xff]  ;;  %v15_v1 = vld [vmem:[%s129_s0 + $0x8] sm:$0xff] }
   0x2   :  { %v17_v2 = vsel %vm16_vm0, %v14_v0, 0.0  ;;  %v20_v3 = vsel %vm16_vm0, %v15_v1, 0.0  ;;  %v77_v21 = vld [vmem:[%s130_s1] ss:$0 sm:$0xff] }
   0x3   :  { %18 = vadd.xlane.f32.xlu0 %v17_v2  ;;  %v78_v23 = vld [vmem:[%s131_s2] ss:$0 sm:$0xff] }
   0x7   :  { %21 = vadd.xlane.f32.xlu0 %v20_v3 }
  0x90   :  { %v19_v4 = vpop.xlane.xlu0 %18 }
  0x91   :  { %v24_v5 = vmul.f32 0.03125, %v19_v4 }
  0x93   :  { %v26_v6 = vsub.f32 %v14_v0, %v24_v5 }
  0x94   :  { %v22_v7 = vpop.xlane.xlu0 %21 }
  0x95   :  { %v25_v8 = vmul.f32 0.03125, %v22_v7  ;;  %v28_v9 = vmul.f32 %v26_v6, %v26_v6 }
  0x97   :  { %v27_v10 = vsub.f32 %v15_v1, %v25_v8  ;;  %v30_v11 = vsel %vm16_vm0, %v28_v9, 0.0 }
  0x98   :  { %31 = vadd.xlane.f32.xlu1 %v30_v11 }
  0x99   :  { %v29_v12 = vmul.f32 %v27_v10, %v27_v10 }
  0x9b   :  { %v33_v13 = vsel %vm16_vm0, %v29_v12, 0.0 }
  0x9c   :  { %34 = vadd.xlane.f32.xlu1 %v33_v13 }
 0x125   :  { %v32_v14 = vpop.xlane.xlu1 %31 }
 0x126   :  { %v36_v15 = vmul.f32 0.03125, %v32_v14 }
 0x128   :  { %v38_v16 = vadd.f32 1e-05, %v36_v15 }
 0x129   :  { %v35_v17 = vpop.xlane.xlu1 %34 }
 0x12a   :  { %83 = vrsqrt.f32 %v38_v16  ;;  %v37_v18 = vmul.f32 0.03125, %v35_v17 }
 0x12c   :  { %v39_v19 = vadd.f32 1e-05, %v37_v18 }
 0x12e   :  { %85 = vrsqrt.f32 %v39_v19 }
 0x134   :  { %v84_v20 = vpop.eup %83 }
 0x135   :  { %v42_v22 = vmul.f32 %v84_v20, %v26_v6 }
 0x137   :  { %v51_v24 = vmul.f32 %v77_v21, %v42_v22 }
 0x138   :  { %v86_v25 = vpop.eup %85 }
 0x139   :  { %v60_v26 = vadd.f32 %v78_v23, %v51_v24  ;;  %v43_v27 = vmul.f32 %v86_v25, %v27_v10 }
 0x13b   :  { %v81_v28 = vpack.c.bf16 %v60_v26, %v60_v26  ;;  %v52_v29 = vmul.f32 %v77_v21, %v43_v27 }
 0x13d   :  { %71 = vst.msk [vmem:[%s132_s3] sm:$0xf] %vm70_vm1, %v81_v28  ;;  %v61_v30 = vadd.f32 %v78_v23, %v52_v29 }
 0x13f   :  { %v82_v31 = vpack.c.bf16 %v61_v30, %v61_v30 }
 0x141   :  { %72 = vst.msk [vmem:[%s132_s3 + $0x4] sm:$0xf] %vm70_vm1, %v82_v31 }

// kernel: gpt2_lm_loss.19
= control target key start
LH: loop header
LB: loop body
LE: loop exit
PB: predicated region body
PF: predicated region fallthrough
CT: control target
= control target key end

     0   :  { %vm19_vm0 = vcmask 261120   ;;  %v137_v0 = vmov 0.0   ;;  %vm138_vm1 = vmmov 0   ;;  %s184_s1 = inlined_call_operand.vmem [shape: bf16[32,32], index: 1, kind: input, shape index: {}]   ;;  %s185_s0 = inlined_call_operand.vmem [shape: bf16[16,32], index: 0, kind: input, shape index: {}]   ;;  %s186_s2 = inlined_call_operand.vmem [shape: f32[1,32], index: 2, kind: input, shape index: {}]   ;;  %s187_s3 = inlined_call_operand.vmem [shape: f32[16,32], index: 3, kind: output, shape index: {}]  }
   0x1   :  { %124 = vmatprep.subr.bf16.mxu0 %v137_v0  ;;  %v134_v1 = vld [vmem:[%s184_s1] sm:$0xff]   ;;  %128 = vmatprep.mubr.msk.bf16.mxu0 %vm138_vm1, %v137_v0  ;;  %20 = vst.msk [vmem:[#allocation2] sm:$0xff] %vm19_vm0, %v137_v0  ;;  %21 = vst.msk [vmem:[#allocation2 + $0x8] sm:$0xff] %vm19_vm0, %v137_v0  ;;  %v135_v2 = vld [vmem:[%s184_s1 + $0x8] sm:$0xff]  }
   0x2   :  { %125 = vmatpush3.bf16.msra.mxu0 %v134_v1  ;;  %v136_v3 = vld [vmem:[%s185_s0] sm:$0xff]  }
   0x3   :  { %126 = vmatprep.subr.bf16.mxu0 %v137_v0  ;;  %v120_v12 = vld [vmem:[%s186_s2] ss:$0 sm:$0xff] }
   0x6   :  { %127 = vmatpush3.bf16.msra.mxu0 %v135_v2 }
   0x8   :  { %v22_v4 = vld [vmem:[#allocation2] sm:$0xff]  ;;  %v23_v6 = vld [vmem:[#allocation2 + $0x8] sm:$0xff] }
   0x9   :  { %129 = vmatmul.mubr.msk.bf16.vlgmr.msra.gmra.mrb[0].mxu0 %vm19_vm0, %v136_v3 }
  0xdc   :  { %v85_v5 = vpop.f32.mrb[0].mxu0 }
  0xdd   :  { %v92_v7 = vadd.f32 %v85_v5, %v22_v4  ;;  %v130_v8 = vpop.f32.mrb[1].mxu0 }
  0xde   :  { %v88_v9 = vpop.f32.mrb[2].mxu0 }
  0xdf   :  { %94 = vst.msk [vmem:[#allocation2] sm:$0xff] %vm19_vm0, %v92_v7  ;;  %v93_v10 = vadd.f32 %v88_v9, %v23_v6  ;;  %v131_v11 = vpop.f32.mrb[3].mxu0 }
  0xe1   :  { %95 = vst.msk [vmem:[#allocation2 + $0x8] sm:$0xff] %vm19_vm0, %v93_v10 }
  0xe6   :  { %v99_v13 = vld [vmem:[#allocation2] sm:$0xff] }
  0xe7   :  { %v108_v14 = vadd.f32 %v120_v12, %v99_v13 }
  0xe8   :  { %v100_v15 = vld [vmem:[#allocation2 + $0x8] sm:$0xff] }
  0xe9   :  { %110 = vst.msk [vmem:[%s187_s3] sm:$0xff] %vm19_vm0, %v108_v14  ;;  %v109_v16 = vadd.f32 %v120_v12, %v100_v15 }
  0xeb   :  { %111 = vst.msk [vmem:[%s187_s3 + $0x8] sm:$0xff] %vm19_vm0, %v109_v16 }

// kernel: gpt2_lm_loss.18
= control target key start
LH: loop header
LB: loop body
LE: loop exit
PB: predicated region body
PF: predicated region fallthrough
CT: control target
= control target key end

     0   :  { %s797_s12 = smov 0   ;;  %s799_s13 = smov 0   ;;  %s853_s0 = inlined_call_operand.vmem [shape: bf16[8,8,8], index: 0, kind: input, shape index: {}]   ;;  %s854_s1 = inlined_call_operand.vmem [shape: bf16[8,8,8], index: 1, kind: input, shape index: {}]   ;;  %s855_s2 = inlined_call_operand.vmem [shape: bf16[8,8,8], index: 2, kind: input, shape index: {}]   ;;  %s856_s3 = inlined_call_operand.vmem [shape: bf16[8,8,8], index: 3, kind: output, shape index: {}]  }
   0x1   :  { %s801_s14 = smov 0  }
   0x2 LB: > { %s32_s15 = sadd.s32 1, %s767_s13  ;;  %p686_p0 = scmp.ge.s32.totalorder %s771_s14, 1  ;;  %s771_s14 = sphi %s801_s14, %s13_s14   ;;  %s767_s13 = sphi %s799_s13, %s858_s13   ;;  %s763_s12 = sphi %s797_s12, %s857_s12  }
   0x3   : > { %p34_p1 = scmp.ge.s32.totalorder %s32_s15, 8  ;;  %p190_p2 = scmp.lt.s32.totalorder %s771_s14, 9 }
   0x5   : > { %s860_s15 = smov (%p34_p1, %s32_s15), 0  ;;  %p191_p3 = pnand %p686_p0, %p190_p2 }
   0x6   : > { %p232_p4 = scmp.lt.s32.totalorder (!%p191_p3), %s763_s12, 7  ;;  %vm268_vm0 = vcmask (!%p191_p3), 64512   ;;  %v773_v0 = vmov (!%p191_p3), 0.0   ;;  %vm774_vm1 = vmmov (!%p191_p3), 0   ;;  %vm265_vm2 = vcmask (!%p191_p3), 7168  }
   0x7   : > { %194 = sbr.rel (%p191_p3) target bundleno = 826 (0x33a), region = 32  ;;  %701 = vmatprep.subr.bf16.mxu0 (!%p191_p3), %v773_v0  ;;  %269 = vst.msk [vmem:[#allocation4] sm:$0xff] (!%p191_p3), %vm268_vm0, %v773_v0  ;;  %703 = vmatprep.mubr.msk.bf16.mxu0 (!%p191_p3), %vm774_vm1, %v773_v0  ;;  %v775_v4 = vmov (!%p191_p3), -1e+30   ;;  %v468_v5 = vlaneseq (!%p191_p3)  ;;  %v776_v15 = vmov (!%p191_p3), 0   ;;  %vm513_vm4 = vcmask (!%p191_p3), 1043456  }
   0x8   : > { %707 = vmatprep.subr.bf16.mxu1 (!%p191_p3), %v773_v0  ;;  %709 = vmatprep.mubr.msk.bf16.mxu1 (!%p191_p3), %vm774_vm1, %v773_v0  ;;  %266 = vst.msk [vmem:[#allocation2] sm:$0xff] (!%p191_p3), %vm265_vm2, %v775_v4  ;;  %267 = vst.msk [vmem:[#allocation3] sm:$0xff] (!%p191_p3), %vm265_vm2, %v773_v0  ;;  %vm573_vm5 = vcmask (!%p191_p3), 60416  }
   0x9   : > { %v469_v6 = vshrl.u32 (!%p191_p3), %v468_v5, 7  ;;  %v473_v7 = vand.u32 (!%p191_p3), 127, %v468_v5  ;;  %741 = vset.pattern.permute.xlu0 (!%p191_p3), %v776_v15  ;;  %742 = vset.pattern.permute.xlu1 (!%p191_p3), %v776_v15 }
   0xb   : > { %vm476_vm3 = vcmp.le.s32.totalorder (!%p191_p3), %v473_v7, %v469_v6 }
   0xe   : > { %s862_s12 = smov (!%p232_p4, %s763_s12), 7  ;;  %v502_v36 = vld [vmem:[#allocation4] sm:$0xff] }
   0xf   : > { %s816_s16 = sshll.u32 %s862_s12, 2  ;;  %v478_v16 = vld [vmem:[#allocation2] sm:$0xff]  ;;  %v494_v30 = vld [vmem:[#allocation3] sm:$0xff] }
  0x10   : > { %s245_s19 = scalar_lea.vmem %s854_s1, %s816_s16  ;;  %s238_s22 = scalar_lea.vmem %s853_s0, %s816_s16 }
  0x11   : > { %v418_v1 = vld [vmem:[%s245_s19] sm:$0xf]  ;;  %s252_s25 = scalar_lea.vmem %s855_s2, %s816_s16  ;;  %s259_s28 = scalar_lea.vmem %s856_s3, %s816_s16 }
  0x12   : > { %v425_v2 = vsel %vm268_vm0, %v418_v1, 0  ;;  %v417_v3 = vld [vmem:[%s238_s22] sm:$0xf] }
  0x13   : > { %702 = vmatpush3.bf16.xpose.msra.mxu0 %v425_v2  ;;  %v419_v20 = vld [vmem:[%s252_s25] sm:$0xf] }
  0x14   : > { %v515_v21 = vsel %vm513_vm4, %v419_v20, 0 }
  0x15   : > { %708 = vmatpush3.bf16.msra.mxu1 %v515_v21 }
  0x1a   : > { %704 = vmatmul.mubr.msk.bf16.vlgmr.msra.gmra.mrb[0].mxu0 %vm268_vm0, %v417_v3 }
  0xed   : > { %v461_v8 = vpop.f32.mrb[0].mxu0 }
  0xee   : > { %v467_v9 = vmul.f32 0.35355338, %v461_v8  ;;  %v705_v10 = vpop.f32.mrb[1].mxu0 }
  0xef   : > { %v464_v11 = vpop.f32.mrb[2].mxu0 }
  0xf0   : > { %v706_v12 = vpop.f32.mrb[3].mxu0  ;;  %v477_v13 = vsel %vm476_vm3, %v467_v9, -1e+30 }
  0xf1   : > { %v479_v14 = vsel %vm268_vm0, %v477_v13, -inf }
  0xf2   : > { %480 = vmax.xlane.f32.xlu0 %v479_v14 }
 0x17f   : > { %v481_v17 = vpop.xlane.xlu0 %480 }
 0x180   : > { %v482_v18 = vmax.f32 %v478_v16, %v481_v17 }
 0x182   : > { %v483_v19 = vsub.f32 %v478_v16, %v482_v18  ;;  %559 = vst.msk [vmem:[#allocation2] sm:$0xff] %vm265_vm2, %v482_v18  ;;  %488 = vperm.xlu0 %741, %v482_v18  }
 0x184   : > { %v484_v28 = vmul.f32 1.442695, %v483_v19 }
 0x201   : > { %v489_v22 = vpop.permute.xlu0 %488 }
 0x202   : > { %v491_v23 = vsub.f32 %v477_v13, %v489_v22 }
 0x204   : > { %v492_v24 = vmul.f32 1.442695, %v491_v23 }
 0x206   : > { %743 = vpow2.f32 %v492_v24 }
 0x207   : > { %745 = vpow2.f32 %v484_v28 }
 0x210   : > { %v744_v25 = vpop.eup %743 }
 0x211   : > { %v496_v26 = vsel %vm268_vm0, %v744_v25, 0.0  ;;  %v509_v27 = vpack.c.bf16 %v744_v25, %v744_v25  ;;  %v746_v29 = vpop.eup %745 }
 0x212   : > { %497 = vadd.xlane.f32.xlu1 %v496_v26  ;;  %v495_v31 = vmul.f32 %v746_v29, %v494_v30 }
 0x213   : > { %710 = vmatmul.mubr.msk.bf16.vlgmr.msra.gmra.mrb[0].mxu1 %vm268_vm0, %v509_v27 }
 0x223   : > { %505 = vperm.xlu1 %742, %v746_v29  }
 0x29f   : > { %v498_v32 = vpop.xlane.xlu1 %497 }
 0x2a0   : > { %v499_v33 = vadd.f32 %v498_v32, %v495_v31 }
 0x2a2   : > { %501 = vst.msk [vmem:[#allocation3] sm:$0xff] %vm265_vm2, %v499_v33 }
 0x2a3   : > { %v506_v37 = vpop.permute.xlu1 %505 }
 0x2a4   : > { %v508_v38 = vmul.f32 %v506_v37, %v502_v36 }
 0x2a9   : > { %v563_v34 = vld [vmem:[#allocation3] sm:$0xff] }
 0x2aa   : > { %747 = vrcp.f32 %v563_v34 }
 0x2b4   : > { %v748_v35 = vpop.eup %747 }
 0x2b5   : > { %568 = vperm.xlu1 %742, %v748_v35  }
 0x2e6   : > { %v551_v39 = vpop.f32.mrb[0].mxu1 }
 0x2e7   : > { %v557_v40 = vadd.f32 %v551_v39, %v508_v38  ;;  %v711_v41 = vpop.f32.mrb[1].mxu1 }
 0x2e8   : > { %v554_v42 = vpop.f32.mrb[2].mxu1 }
 0x2e9   : > { %558 = vst.msk [vmem:[#allocation4] sm:$0xff] %vm268_vm0, %v557_v40  ;;  %v712_v43 = vpop.f32.mrb[3].mxu1 }
 0x2f0   : > { %v565_v44 = vld [vmem:[#allocation4] sm:$0xff] }
 0x334   : > { %v569_v45 = vpop.permute.xlu1 %568 }
 0x335   : > { %v571_v46 = vmul.f32 %v569_v45, %v565_v44 }
 0x337   : > { %v572_v47 = vpack.c.bf16 %v571_v46, %v571_v46 }
 0x339   : > { %574 = vst.msk [vmem:[%s259_s28] sm:$0xf] %vm573_vm5, %v572_v47 }
 0x33a PF: > { %s13_s14 = sadd.s32 1, %s771_s14   ;;  %s857_s12 = smov %s767_s13 }
 0x33b   : > { %p10_p5 = scmp.ge.s32.totalorder %s13_s14, 10   ;;  %s858_s13 = smov %s860_s15 }
 0x33d   :  { %12 = sbr.rel (!%p10_p5) target bundleno = 2 (0x2), region = 84 }

// kernel: gpt2_lm_loss.21
= control target key start
LH: loop header
LB: loop body
LE: loop exit
PB: predicated region body
PF: predicated region fallthrough
CT: control target
= control target key end

     0   :  { %v175_v0 = vmov 0.0   ;;  %vm176_vm0 = vmmov 0   ;;  %vm46_vm1 = vcmask 261120   ;;  %s212_s1 = inlined_call_operand.vmem [shape: bf16[32,128], index: 1, kind: input, shape index: {}]   ;;  %s213_s0 = inlined_call_operand.vmem [shape: bf16[16,32], index: 0, kind: input, shape index: {}]   ;;  %s214_s2 = inlined_call_operand.vmem [shape: f32[1,128], index: 2, kind: input, shape index: {}]   ;;  %s215_s3 = inlined_call_operand.vmem [shape: bf16[16,128], index: 3, kind: output, shape index: {}]  }
   0x1   :  { %158 = vmatprep.subr.bf16.mxu0 %v175_v0  ;;  %v168_v1 = vld [vmem:[%s212_s1] sm:$0xff]   ;;  %162 = vmatprep.mubr.msk.bf16.mxu0 %vm176_vm0, %v175_v0  ;;  %v169_v2 = vld [vmem:[%s212_s1 + $0x8] sm:$0xff]  }
   0x2   :  { %159 = vmatpush3.bf16.msra.mxu0 %v168_v1  ;;  %v170_v3 = vld [vmem:[%s213_s0] sm:$0xff]  }
   0x3   :  { %160 = vmatprep.subr.bf16.mxu0 %v175_v0  ;;  %v145_v4 = vld [vmem:[%s214_s2] ss:$0 sm:$0xff] }
   0x6   :  { %161 = vmatpush3.bf16.msra.mxu0 %v169_v2 }
   0x9   :  { %163 = vmatmul.mubr.msk.bf16.vlgmr.msra.gmra.mrb[0].mxu0 %vm46_vm1, %v170_v3 }
  0xdc   :  { %v84_v5 = vpop.f32.mrb[0].mxu0 }
  0xdd   :  { %v107_v6 = vadd.f32 %v145_v4, %v84_v5  ;;  %v164_v7 = vpop.f32.mrb[1].mxu0 }
  0xde   :  { %v87_v8 = vpop.f32.mrb[2].mxu0 }
  0xdf   :  { %v111_v9 = vmul.f32 0.044715, %v107_v6  ;;  %v108_v10 = vadd.f32 %v145_v4, %v87_v8  ;;  %v165_v11 = vpop.f32.mrb[3].mxu0  ;;  %v109_v24 = vmul.f32 0.5, %v107_v6 }
  0xe1   :  { %v113_v12 = vmul.f32 %v111_v9, %v107_v6  ;;  %v112_v13 = vmul.f32 0.044715, %v108_v10  ;;  %v110_v25 = vmul.f32 0.5, %v108_v10 }
  0xe3   :  { %v115_v14 = vmul.f32 %v113_v12, %v107_v6  ;;  %v114_v15 = vmul.f32 %v112_v13, %v108_v10 }
  0xe5   :  { %v117_v16 = vadd.f32 %v115_v14, %v107_v6  ;;  %v116_v17 = vmul.f32 %v114_v15, %v108_v10 }
  0xe7   :  { %v119_v18 = vmul.f32 0.7978846, %v117_v16  ;;  %v118_v19 = vadd.f32 %v116_v17, %v108_v10 }
  0xe9   :  { %171 = vtanh.f32 %v119_v18  ;;  %v120_v20 = vmul.f32 0.7978846, %v118_v19 }
  0xeb   :  { %173 = vtanh.f32 %v120_v20 }
  0xf3   :  { %v172_v21 = vpop.eup %171 }
  0xf4   :  { %v123_v22 = vadd.f32 1.0, %v172_v21 }
  0xf5   :  { %v174_v23 = vpop.eup %173 }
  0xf6   :  { %v124_v26 = vadd.f32 1.0, %v174_v23  ;;  %v125_v27 = vmul.f32 %v123_v22, %v109_v24 }
  0xf8   :  { %v126_v28 = vmul.f32 %v124_v26, %v110_v25 }
  0xfa   :  { %v153_v29 = vpack.c.bf16 %v126_v28, %v125_v27 }
  0xfc   :  { %154 = vst [vmem:[%s215_s3] sm:$0xff] %v153_v29  }

// kernel: gpt2_lm_loss.31
= control target key start
LH: loop header
LB: loop body
LE: loop exit
PB: predicated region body
PF: predicated region fallthrough
CT: control target
= control target key end

     0   :  { %vm61_vm0 = vcmask 261120   ;;  %v279_v0 = vmov 0.0   ;;  %vm280_vm1 = vmmov 0   ;;  %v281_v10 = vmov 0   ;;  %s374_s1 = inlined_call_operand.vmem [shape: bf16[64,32], index: 1, kind: input, shape index: {}]   ;;  %s375_s0 = inlined_call_operand.vmem [shape: bf16[16,32], index: 0, kind: input, shape index: {}]   ;;  %s376_s2 = inlined_call_operand.vmem [shape: s32[16,1], index: 2, kind: input, shape index: {}]   ;;  %s377_s3 = inlined_call_operand.vmem [shape: f32[16,1], index: 3, kind: output, shape index: {}]  }
   0x1   :  { %244 = vmatprep.subr.bf16.mxu0 %v279_v0  ;;  %v262_v1 = vld [vmem:[%s374_s1] sm:$0xff]   ;;  %252 = vmatprep.mubr.msk.bf16.mxu0 %vm280_vm1, %v279_v0  ;;  %v263_v3 = vld [vmem:[%s374_s1 + $0x8] sm:$0xff]   ;;  %v264_v5 = vld [vmem:[%s374_s1 + $0x10] sm:$0xff]   ;;  %vm19_vm2 = vcmask 7168   ;;  %v282_v11 = vmov -1e+30   ;;  %v119_v12 = vlaneseq }
   0x2   :  { %v66_v2 = vsel %vm61_vm0, %v262_v1, 0  ;;  %v69_v4 = vsel %vm61_vm0, %v263_v3, 0  ;;  %v72_v6 = vsel %vm61_vm0, %v264_v5, 0  ;;  %v265_v7 = vld [vmem:[%s374_s1 + $0x18] sm:$0xff]   ;;  %v266_v9 = vld [vmem:[%s375_s0] sm:$0xff]   ;;  %261 = vset.pattern.permute.xlu0 %v281_v10  ;;  %260 = vset.pattern.permute.xlu1 %v281_v10  ;;  %20 = vst.msk [vmem:[#allocation2] sm:$0xff] %vm19_vm2, %v282_v11 }
   0x3   :  { %245 = vmatpush3.bf16.xpose.msra.mxu0 %v66_v2  ;;  %v75_v8 = vsel %vm61_vm0, %v265_v7, 0  ;;  %21 = vst.msk [vmem:[#allocation2 + $0x8] sm:$0xff] %vm19_vm2, %v282_v11  ;;  %22 = vst.msk [vmem:[#allocation3] sm:$0xff] %vm19_vm2, %v279_v0  ;;  %v120_v13 = vand.u32 127, %v119_v12  ;;  %vm140_vm4 = vcmask 523264   ;;  %v343_v22 = vld [vmem:[%s376_s2] sm:$0xff] }
   0x4   :  { %246 = vmatprep.subr.bf16.mxu0 %v279_v0  ;;  %23 = vst.msk [vmem:[#allocation3 + $0x8] sm:$0xff] %vm19_vm2, %v279_v0  ;;  %24 = vst.msk [vmem:[#allocation4] sm:$0xff] %vm19_vm2, %v279_v0  ;;  %v351_v31 = vld [vmem:[%s376_s2 + $0x8] sm:$0xff]  ;;  %vm213_vm7 = vcmp.ne.s32.totalorder %v343_v22, 4294967196 }
   0x5   :  { %25 = vst.msk [vmem:[#allocation4 + $0x8] sm:$0xff] %vm19_vm2, %v279_v0  ;;  %vm123_vm3 = vcmp.lt.s32.totalorder %v120_v13, 64  ;;  %v237_v10 = vsel %vm213_vm7, 1.0, %v279_v0  ;;  %vm214_vm8 = vcmp.ne.s32.totalorder %v351_v31, 4294967196 }
   0x9   :  { %v152_v23 = vld [vmem:[#allocation2] sm:$0xff] }
   0xa   :  { %v153_v26 = vld [vmem:[#allocation2 + $0x8] sm:$0xff]  ;;  %v168_v54 = vld [vmem:[#allocation3] sm:$0xff] }
   0xb   :  { %247 = vmatpush3.bf16.xpose.msra.mxu0 %v69_v4  ;;  %v128_v48 = vld [vmem:[#allocation4] sm:$0xff]  ;;  %v169_v58 = vld [vmem:[#allocation3 + $0x8] sm:$0xff] }
   0xc   :  { %248 = vmatprep.subr.bf16.mxu0 %v279_v0  ;;  %v129_v63 = vld [vmem:[#allocation4 + $0x8] sm:$0xff] }
  0x13   :  { %249 = vmatpush3.bf16.xpose.msra.mxu0 %v72_v6 }
  0x14   :  { %250 = vmatprep.subr.bf16.mxu0 %v279_v0 }
  0x1b   :  { %251 = vmatpush3.bf16.xpose.msra.mxu0 %v75_v8 }
  0x22   :  { %253 = vmatmul.mubr.msk.bf16.vlgmr.msra.gmra.mrb[0].mxu0 %vm61_vm0, %v266_v9 }
  0xf5   :  { %v111_v14 = vpop.f32.mrb[0].mxu0 }
  0xf6   :  { %v124_v15 = vsel %vm123_vm3, %v111_v14, -1e+30  ;;  %v254_v16 = vpop.f32.mrb[1].mxu0 }
  0xf7   :  { %v114_v17 = vpop.f32.mrb[2].mxu0  ;;  %v154_v18 = vsel %vm140_vm4, %v124_v15, -inf }
  0xf8   :  { %v125_v19 = vsel %vm123_vm3, %v114_v17, -1e+30  ;;  %155 = vmax.xlane.f32.xlu0 %v154_v18  ;;  %v255_v20 = vpop.f32.mrb[3].mxu0  ;;  %v238_v17 = vsel %vm214_vm8, 1.0, %v279_v0 }
  0xf9   :  { %v157_v21 = vsel %vm140_vm4, %v125_v19, -inf }
  0xfc   :  { %158 = vmax.xlane.f32.xlu0 %v157_v21 }
 0x112   :  { %131 = vperm.xlu0 %261, %v343_v22  }
 0x185   :  { %v156_v24 = vpop.xlane.xlu0 %155 }
 0x186   :  { %v160_v25 = vmax.f32 %v152_v23, %v156_v24 }
 0x188   :  { %v162_v27 = vsub.f32 %v152_v23, %v160_v25  ;;  %198 = vst.msk [vmem:[#allocation2] sm:$0xff] %vm19_vm2, %v160_v25  ;;  %174 = vperm.xlu1 %260, %v160_v25  }
 0x189   :  { %v159_v28 = vpop.xlane.xlu0 %158 }
 0x18a   :  { %v161_v29 = vmax.f32 %v153_v26, %v159_v28  ;;  %v164_v51 = vmul.f32 1.442695, %v162_v27 }
 0x18c   :  { %v163_v30 = vsub.f32 %v153_v26, %v161_v29  ;;  %199 = vst.msk [vmem:[#allocation2 + $0x8] sm:$0xff] %vm19_vm2, %v161_v29  ;;  %179 = vperm.xlu1 %260, %v161_v29  }
 0x18e   :  { %v166_v52 = vmul.f32 1.442695, %v163_v30 }
 0x18f   :  { %v203_v7 = vld [vmem:[#allocation2] sm:$0xff] }
 0x190   :  { %134 = vperm.xlu1 %260, %v351_v31  }
 0x191   :  { %v132_v32 = vpop.permute.xlu0 %131 }
 0x192   :  { %vm136_vm5 = vcmp.eq.s32.totalorder %v120_v13, %v132_v32 }
 0x193   :  { %v138_v33 = vsel %vm136_vm5, %v124_v15, 0.0  ;;  %v204_v14 = vld [vmem:[#allocation2 + $0x8] sm:$0xff] }
 0x194   :  { %v141_v34 = vsel %vm140_vm4, %v138_v33, 0.0 }
 0x195   :  { %142 = vadd.xlane.f32.xlu0 %v141_v34 }
 0x207   :  { %v175_v35 = vpop.permute.xlu1 %174 }
 0x208   :  { %v182_v36 = vsub.f32 %v124_v15, %v175_v35 }
 0x20a   :  { %v184_v37 = vmul.f32 1.442695, %v182_v36 }
 0x20b   :  { %v180_v38 = vpop.permute.xlu1 %179 }
 0x20c   :  { %267 = vpow2.f32 %v184_v37  ;;  %v183_v39 = vsub.f32 %v125_v19, %v180_v38 }
 0x20e   :  { %v186_v40 = vmul.f32 1.442695, %v183_v39 }
 0x20f   :  { %v135_v42 = vpop.permute.xlu1 %134 }
 0x210   :  { %269 = vpow2.f32 %v186_v40  ;;  %vm137_vm6 = vcmp.eq.s32.totalorder %v120_v13, %v135_v42 }
 0x211   :  { %v139_v46 = vsel %vm137_vm6, %v125_v19, 0.0  ;;  %271 = vpow2.f32 %v164_v51 }
 0x212   :  { %v144_v47 = vsel %vm140_vm4, %v139_v46, 0.0  ;;  %273 = vpow2.f32 %v166_v52 }
 0x216   :  { %v268_v41 = vpop.eup %267 }
 0x217   :  { %v188_v43 = vsel %vm140_vm4, %v268_v41, 0.0 }
 0x218   :  { %189 = vadd.xlane.f32.xlu1 %v188_v43 }
 0x21a   :  { %v270_v44 = vpop.eup %269 }
 0x21b   :  { %v191_v45 = vsel %vm140_vm4, %v270_v44, 0.0  ;;  %v272_v53 = vpop.eup %271 }
 0x21c   :  { %192 = vadd.xlane.f32.xlu1 %v191_v45  ;;  %v170_v55 = vmul.f32 %v272_v53, %v168_v54  ;;  %v274_v56 = vpop.eup %273 }
 0x21d   :  { %v171_v60 = vmul.f32 %v274_v56, %v169_v58 }
 0x220   :  { %145 = vadd.xlane.f32.xlu1 %v144_v47 }
 0x222   :  { %v143_v49 = vpop.xlane.xlu0 %142 }
 0x223   :  { %v147_v50 = vadd.f32 %v143_v49, %v128_v48 }
 0x225   :  { %150 = vst.msk [vmem:[#allocation4] sm:$0xff] %vm19_vm2, %v147_v50 }
 0x22c   :  { %v219_v11 = vld [vmem:[#allocation4] sm:$0xff] }
 0x2a5   :  { %v190_v57 = vpop.xlane.xlu1 %189 }
 0x2a6   :  { %v194_v59 = vadd.f32 %v190_v57, %v170_v55 }
 0x2a8   :  { %196 = vst.msk [vmem:[#allocation3] sm:$0xff] %vm19_vm2, %v194_v59 }
 0x2a9   :  { %v193_v61 = vpop.xlane.xlu1 %192 }
 0x2aa   :  { %v195_v62 = vadd.f32 %v193_v61, %v171_v60 }
 0x2ac   :  { %197 = vst.msk [vmem:[#allocation3 + $0x8] sm:$0xff] %vm19_vm2, %v195_v62 }
 0x2ad   :  { %v146_v1 = vpop.xlane.xlu1 %145 }
 0x2ae   :  { %v148_v2 = vadd.f32 %v146_v1, %v129_v63 }
 0x2af   :  { %v205_v3 = vld [vmem:[#allocation3] sm:$0xff] }
 0x2b0   :  { %275 = vlog2.f32 %v205_v3  ;;  %151 = vst.msk [vmem:[#allocation4 + $0x8] sm:$0xff] %vm19_vm2, %v148_v2 }
 0x2b3   :  { %v206_v4 = vld [vmem:[#allocation3 + $0x8] sm:$0xff] }
 0x2b4   :  { %277 = vlog2.f32 %v206_v4 }
 0x2b7   :  { %v220_v18 = vld [vmem:[#allocation4 + $0x8] sm:$0xff] }
 0x2ba   :  { %v276_v5 = vpop.eup %275 }
 0x2bb   :  { %v208_v6 = vmul.f32 0.6931472, %v276_v5 }
 0x2bd   :  { %v211_v8 = vadd.f32 %v208_v6, %v203_v7 }
 0x2be   :  { %v278_v9 = vpop.eup %277 }
 0x2bf   :  { %v221_v12 = vsub.f32 %v211_v8, %v219_v11  ;;  %v210_v13 = vmul.f32 0.6931472, %v278_v9 }
 0x2c1   :  { %v223_v15 = vmul.f32 %v237_v10, %v221_v12  ;;  %v212_v16 = vadd.f32 %v210_v13, %v204_v14 }
 0x2c3   :  { %v222_v19 = vsub.f32 %v212_v16, %v220_v18  ;;  %225 = vst.msk [vmem:[%s377_s3] sm:$0xff] %vm19_vm2, %v223_v15 }
 0x2c5   :  { %v224_v20 = vmul.f32 %v238_v17, %v222_v19 }
 0x2c7   :  { %226 = vst.msk [vmem:[%s377_s3 + $0x8] sm:$0xff] %vm19_vm2, %v224_v20 }

// kernel: gpt2_lm_loss.22
= control target key start
LH: loop header
LB: loop body
LE: loop exit
PB: predicated region body
PF: predicated region fallthrough
CT: control target
= control target key end

     0   :  { %vm19_vm0 = vcmask 261120   ;;  %v212_v0 = vmov 0.0   ;;  %vm213_vm1 = vmmov 0   ;;  %s276_s1 = inlined_call_operand.vmem [shape: bf16[128,32], index: 1, kind: input, shape index: {}]   ;;  %s277_s0 = inlined_call_operand.vmem [shape: bf16[16,128], index: 0, kind: input, shape index: {}]   ;;  %s278_s2 = inlined_call_operand.vmem [shape: f32[1,32], index: 2, kind: input, shape index: {}]   ;;  %s279_s3 = inlined_call_operand.vmem [shape: f32[16,32], index: 3, kind: output, shape index: {}]  }
   0x1   :  { %181 = vmatprep.subr.bf16.mxu0 %v212_v0  ;;  %v203_v1 = vld [vmem:[%s276_s1] sm:$0xff]   ;;  %197 = vmatprep.mubr.msk.bf16.mxu0 %vm213_vm1, %v212_v0  ;;  %20 = vst.msk [vmem:[#allocation2] sm:$0xff] %vm19_vm0, %v212_v0  ;;  %21 = vst.msk [vmem:[#allocation2 + $0x8] sm:$0xff] %vm19_vm0, %v212_v0  ;;  %v204_v2 = vld [vmem:[%s276_s1 + $0x8] sm:$0xff]  }
   0x2   :  { %182 = vmatpush3.bf16.msra.mxu0 %v203_v1  ;;  %v205_v3 = vld [vmem:[%s276_s1 + $0x10] sm:$0xff]   ;;  %v206_v4 = vld [vmem:[%s276_s1 + $0x18] sm:$0xff]   ;;  %v207_v5 = vld [vmem:[%s276_s1 + $0x20] sm:$0xff]  }
   0x3   :  { %183 = vmatprep.subr.bf16.mxu0 %v212_v0  ;;  %v208_v6 = vld [vmem:[%s276_s1 + $0x28] sm:$0xff]   ;;  %v209_v7 = vld [vmem:[%s276_s1 + $0x30] sm:$0xff]   ;;  %v210_v8 = vld [vmem:[%s276_s1 + $0x38] sm:$0xff]  }
   0x4   :  { %v211_v9 = vld [vmem:[%s277_s0] sm:$0xff]  }
   0x5   :  { %v171_v18 = vld [vmem:[%s278_s2] ss:$0 sm:$0xff] }
   0x6   :  { %184 = vmatpush3.bf16.msra.mxu0 %v204_v2 }
   0x7   :  { %185 = vmatprep.subr.bf16.mxu0 %v212_v0 }
   0x8   :  { %v22_v10 = vld [vmem:[#allocation2] sm:$0xff]  ;;  %v23_v12 = vld [vmem:[#allocation2 + $0x8] sm:$0xff] }
   0xa   :  { %186 = vmatpush3.bf16.msra.mxu0 %v205_v3 }
   0xb   :  { %187 = vmatprep.subr.bf16.mxu0 %v212_v0 }
   0xe   :  { %188 = vmatpush3.bf16.msra.mxu0 %v206_v4 }
   0xf   :  { %189 = vmatprep.subr.bf16.mxu0 %v212_v0 }
  0x12   :  { %190 = vmatpush3.bf16.msra.mxu0 %v207_v5 }
  0x13   :  { %191 = vmatprep.subr.bf16.mxu0 %v212_v0 }
  0x16   :  { %192 = vmatpush3.bf16.msra.mxu0 %v208_v6 }
  0x17   :  { %193 = vmatprep.subr.bf16.mxu0 %v212_v0 }
  0x1a   :  { %194 = vmatpush3.bf16.msra.mxu0 %v209_v7 }
  0x1b   :  { %195 = vmatprep.subr.bf16.mxu0 %v212_v0 }
  0x1e   :  { %196 = vmatpush3.bf16.msra.mxu0 %v210_v8 }
  0x21   :  { %198 = vmatmul.mubr.bf16.vlgmr.msra.gmra.mrb[0].mxu0 %v211_v9 }
  0xf4   :  { %v130_v11 = vpop.f32.mrb[0].mxu0 }
  0xf5   :  { %v137_v13 = vadd.f32 %v130_v11, %v22_v10  ;;  %v199_v14 = vpop.f32.mrb[1].mxu0 }
  0xf6   :  { %v133_v15 = vpop.f32.mrb[2].mxu0 }
  0xf7   :  { %140 = vst.msk [vmem:[#allocation2] sm:$0xff] %vm19_vm0, %v137_v13  ;;  %v138_v16 = vadd.f32 %v133_v15, %v23_v12  ;;  %v200_v17 = vpop.f32.mrb[3].mxu0 }
  0xf9   :  { %141 = vst.msk [vmem:[#allocation2 + $0x8] sm:$0xff] %vm19_vm0, %v138_v16 }
  0xfe   :  { %v145_v19 = vld [vmem:[#allocation2] sm:$0xff] }
  0xff   :  { %v154_v20 = vadd.f32 %v171_v18, %v145_v19 }
 0x100   :  { %v146_v21 = vld [vmem:[#allocation2 + $0x8] sm:$0xff] }
 0x101   :  { %156 = vst.msk [vmem:[%s279_s3] sm:$0xff] %vm19_vm0, %v154_v20  ;;  %v155_v22 = vadd.f32 %v171_v18, %v146_v21 }
 0x103   :  { %157 = vst.msk [vmem:[%s279_s3 + $0x8] sm:$0xff] %vm19_vm0, %v155_v22 }

</bundles_post_ra>
